<compile_context>
chip_gen: v7x
topology: tpu7x:2x2x1
jax: 0.10.0
libtpu: 0.0.40
codegen_flags: <defaults>
</compile_context>

<pallas_src>
import numpy as np
import jax
import jax.numpy as jnp
from jax import lax
from jax.experimental import pallas as pl
from jax.experimental.pallas import tpu as pltpu


# ----------------------------------------------------------------------------
# Trace-time constants (numpy): windowed + envelope-normalized irFFT bases
# ----------------------------------------------------------------------------
def make_istft_bases(nfft):
    """Transposed inverse-rFFT bases (nfft, F) with the periodic Hann window
    and the istft 1/sum(window^2) overlap-add normalization folded in.

    Folding the envelope is exact for the center-trimmed output region with
    hop = nfft//2 (50% overlap), where env[n] = w^2[n%hop] + w^2[n%hop + hop]
    is independent of the frame index.
    """
    hop = nfft // 2
    n = np.arange(nfft)
    # torch.hann_window(nfft) (periodic): 0.5 * (1 - cos(2*pi*n/nfft))
    window = 0.5 * (1.0 - np.cos(2.0 * np.pi * n / nfft))
    wsq = window ** 2
    env = wsq[:hop] + wsq[hop:]                 # OLA window^2 envelope (per r)
    scale = np.tile(1.0 / env, 2)               # s[n] = 1 / env[n % hop]
    wn = window * scale                         # window + envelope normalization

    nbins = nfft // 2 + 1
    k = np.arange(nbins)[:, None]
    ang = 2.0 * np.pi * k * n[None, :] / nfft
    coef = np.full((nbins, 1), 2.0 / nfft)
    coef[0, 0] = 1.0 / nfft                     # DC
    coef[-1, 0] = 1.0 / nfft                    # Nyquist
    bc = coef * np.cos(ang) * wn[None, :]       # (F, nfft)
    bs = coef * np.sin(ang) * wn[None, :]
    bs[0, :] = 0.0                              # irfft ignores imag(DC)
    bs[-1, :] = 0.0                             # ... and imag(Nyquist)
    bcT = np.ascontiguousarray(bc.T)            # (nfft, F)
    bsnT = np.ascontiguousarray(-bs.T)          # minus sign folded in
    return jnp.asarray(bcT, jnp.float32), jnp.asarray(bsnT, jnp.float32)


# ----------------------------------------------------------------------------
# Fused kernel: compressed spectral MSE partials + ISTFT + OLA + SI-SNR
# ----------------------------------------------------------------------------
def _loss_hybrid_kernel(pr_ref, pi_ref, tr_ref, ti_ref, bc_ref, bs_ref,
                        out_ref):
    pr = pr_ref[...]                 # (F, T)
    pi = pi_ref[...]
    tr = tr_ref[...]
    ti = ti_ref[...]

    # --- compressed spectral losses (EUP-lean: 1 log + 2 exp per tensor) ---
    pm2 = pr * pr + pi * pi + 1e-12          # |X|^2 + eps
    tm2 = tr * tr + ti * ti + 1e-12
    plog = jnp.log(pm2)
    tlog = jnp.log(tm2)
    pc = jnp.exp(-0.35 * plog)               # (|X|^2+eps)^-0.35 = mag^-0.7
    tc = jnp.exp(-0.35 * tlog)
    dr = pr * pc - tr * tc
    di = pi * pc - ti * tc
    dm = jnp.exp(0.15 * plog) - jnp.exp(0.15 * tlog)   # mag^0.3 difference
    s_real = jnp.sum(dr * dr)
    s_imag = jnp.sum(di * di)
    s_mag = jnp.sum(dm * dm)

    # --- windowed + envelope-normalized inverse-rFFT frames (MXU) ---
    bc = bc_ref[...]                 # (nfft, F)
    bs = bs_ref[...]                 # (nfft, F) == -sin basis
    fp = (jnp.dot(bc, pr, preferred_element_type=jnp.float32)
          + jnp.dot(bs, pi, preferred_element_type=jnp.float32))   # (nfft, T)
    ft = (jnp.dot(bc, tr, preferred_element_type=jnp.float32)
          + jnp.dot(bs, ti, preferred_element_type=jnp.float32))

    # --- overlap-add of the center-trimmed region (hop == nfft // 2) ---
    nfft = bc.shape[0]
    hop = nfft // 2
    T = pr.shape[1]
    # trimmed signal sample m*hop + r  ==  frames[hop + r, m] + frames[r, m+1]
    yp = fp[hop:, : T - 1] + fp[:hop, 1:]      # (hop, T-1) ~ full istft output
    yt = ft[hop:, : T - 1] + ft[:hop, 1:]

    # --- SI-SNR-style term over the whole per-batch signal ---
    dot = jnp.sum(yt * yp)
    energy = jnp.sum(yt * yt)
    scale = dot / (energy + 1e-8)
    s_t = scale * yt
    num = jnp.sum(s_t * s_t)
    den = jnp.sum((yp - s_t) * (yp - s_t))
    ratio = num / (den + 1e-8) + 1e-8
    sisnr_b = -jnp.log(ratio) * np.float32(1.0 / np.log(10.0))   # -log10(ratio)

    # Per-batch partials as one lane-dense (8,128) VMEM tile:
    # rows 0..3 hold s_real / s_imag / s_mag / sisnr_b, rest zero.
    rows = lax.broadcasted_iota(jnp.int32, (8, 128), 0)
    out_ref[...] = jnp.where(rows == 0, s_real,
                   jnp.where(rows == 1, s_imag,
                   jnp.where(rows == 2, s_mag,
                   jnp.where(rows == 3, sisnr_b, 0.0))))


def _fused_losses(pr, pi, tr, ti, bcT, bsnT):
    B, F, T = pr.shape
    nfft = bcT.shape[0]
    spec_spec = pl.BlockSpec((None, F, T), lambda b: (b, 0, 0))
    basis_spec = pl.BlockSpec((nfft, F), lambda b: (0, 0))
    out_spec = pl.BlockSpec((None, 8, 128), lambda b: (b, 0, 0))

    return pl.pallas_call(
        _loss_hybrid_kernel,
        grid=(B,),
        in_specs=[spec_spec, spec_spec, spec_spec, spec_spec,
                  basis_spec, basis_spec],
        out_specs=out_spec,
        out_shape=jax.ShapeDtypeStruct((B, 8, 128), jnp.float32),
        compiler_params=pltpu.CompilerParams(
            dimension_semantics=("parallel",),        # megacore shard over batch
            vmem_limit_bytes=32 * 1024 * 1024),       # safe on v5e/v6e/v7x
    )(pr, pi, tr, ti, bcT, bsnT)


# ----------------------------------------------------------------------------
# Full forward pass
# ----------------------------------------------------------------------------
def loss_hybrid(pred_stft, true_stft):
    B, F, T, _ = pred_stft.shape
    nfft = (F - 1) * 2
    hop = nfft // 2
    assert hop * 2 == nfft, "overlap-add path assumes hop == nfft // 2"

    bcT, bsnT = make_istft_bases(nfft)

    pr = pred_stft[..., 0].astype(jnp.float32)
    pi = pred_stft[..., 1].astype(jnp.float32)
    tr = true_stft[..., 0].astype(jnp.float32)
    ti = true_stft[..., 1].astype(jnp.float32)

    parts = _fused_losses(pr, pi, tr, ti, bcT, bsnT)   # (B, 8, 128)
    sums = jnp.sum(parts[:, :4, 0], axis=0)            # (4,)

    inv_n = 1.0 / float(B * F * T)
    real_loss = sums[0] * inv_n
    imag_loss = sums[1] * inv_n
    mag_loss = sums[2] * inv_n
    sisnr = sums[3] / float(B)

    return 30.0 * (real_loss + imag_loss) + 70.0 * mag_loss + sisnr


if __name__ == "__main__":
    key = jax.random.PRNGKey(0)
    k1, k2 = jax.random.split(key)
    B, F, T = 2, 65, 9            # nfft = 128, hop = 64, istft length = 512
    pred_stft = jax.random.normal(k1, (B, F, T, 2), jnp.float32)
    true_stft = jax.random.normal(k2, (B, F, T, 2), jnp.float32)

    out = jax.jit(loss_hybrid)(pred_stft, true_stft)
    jax.block_until_ready(out)
    assert out.shape == () and bool(jnp.isfinite(out))
    print("KERNEL_OK")
</pallas_src>

<mosaic_0001>
module attributes {stable_mosaic.version = 11 : i64} {
  func.func @_loss_hybrid_kernel(%arg0: i32, %arg1: memref<1x65x9xf32, #tpu.memory_space<vmem>>, %arg2: memref<1x65x9xf32, #tpu.memory_space<vmem>>, %arg3: memref<1x65x9xf32, #tpu.memory_space<vmem>>, %arg4: memref<1x65x9xf32, #tpu.memory_space<vmem>>, %arg5: memref<128x65xf32, #tpu.memory_space<vmem>>, %arg6: memref<128x65xf32, #tpu.memory_space<vmem>>, %arg7: memref<1x8x128xf32, #tpu.memory_space<vmem>>) attributes {dimension_semantics = [#tpu.dimension_semantics<parallel>], iteration_bounds = array<i64: 2>, scalar_prefetch = 0 : i64, scratch_operands = 0 : i64, tpu.core_type = #tpu.core_type<tc>, window_params = [{transform_indices = @transform_0, window_bounds = array<i64: 1, 65, 9>}, {transform_indices = @transform_1, window_bounds = array<i64: 1, 65, 9>}, {transform_indices = @transform_2, window_bounds = array<i64: 1, 65, 9>}, {transform_indices = @transform_3, window_bounds = array<i64: 1, 65, 9>}, {pipeline_mode = #tpu.pipeline_mode<synchronous>, transform_indices = @transform_4, window_bounds = array<i64: 128, 65>}, {pipeline_mode = #tpu.pipeline_mode<synchronous>, transform_indices = @transform_5, window_bounds = array<i64: 128, 65>}, {transform_indices = @transform_6, window_bounds = array<i64: 1, 8, 128>}]} {
    %c0 = arith.constant 0 : index
    %c0_0 = arith.constant 0 : index
    %c0_1 = arith.constant 0 : index
    %0 = vector.load %arg1[%c0, %c0_0, %c0_1] : memref<1x65x9xf32, #tpu.memory_space<vmem>>, vector<1x65x9xf32>
    %1 = vector.shape_cast %0 : vector<1x65x9xf32> to vector<65x9xf32>
    %c0_2 = arith.constant 0 : index
    %c0_3 = arith.constant 0 : index
    %c0_4 = arith.constant 0 : index
    %2 = vector.load %arg2[%c0_2, %c0_3, %c0_4] : memref<1x65x9xf32, #tpu.memory_space<vmem>>, vector<1x65x9xf32>
    %3 = vector.shape_cast %2 : vector<1x65x9xf32> to vector<65x9xf32>
    %c0_5 = arith.constant 0 : index
    %c0_6 = arith.constant 0 : index
    %c0_7 = arith.constant 0 : index
    %4 = vector.load %arg3[%c0_5, %c0_6, %c0_7] : memref<1x65x9xf32, #tpu.memory_space<vmem>>, vector<1x65x9xf32>
    %5 = vector.shape_cast %4 : vector<1x65x9xf32> to vector<65x9xf32>
    %c0_8 = arith.constant 0 : index
    %c0_9 = arith.constant 0 : index
    %c0_10 = arith.constant 0 : index
    %6 = vector.load %arg4[%c0_8, %c0_9, %c0_10] : memref<1x65x9xf32, #tpu.memory_space<vmem>>, vector<1x65x9xf32>
    %7 = vector.shape_cast %6 : vector<1x65x9xf32> to vector<65x9xf32>
    %8 = arith.mulf %1, %1 : vector<65x9xf32>
    %9 = arith.mulf %3, %3 : vector<65x9xf32>
    %10 = arith.addf %8, %9 : vector<65x9xf32>
    %cst = arith.constant 9.99999996E-13 : f32
    %11 = vector.broadcast %cst : f32 to vector<65x9xf32>
    %12 = arith.addf %10, %11 : vector<65x9xf32>
    %13 = arith.mulf %5, %5 : vector<65x9xf32>
    %14 = arith.mulf %7, %7 : vector<65x9xf32>
    %15 = arith.addf %13, %14 : vector<65x9xf32>
    %cst_11 = arith.constant 9.99999996E-13 : f32
    %16 = vector.broadcast %cst_11 : f32 to vector<65x9xf32>
    %17 = arith.addf %15, %16 : vector<65x9xf32>
    %18 = math.log %12 : vector<65x9xf32>
    %19 = math.log %17 : vector<65x9xf32>
    %cst_12 = arith.constant -3.500000e-01 : f32
    %20 = vector.broadcast %cst_12 : f32 to vector<65x9xf32>
    %21 = arith.mulf %20, %18 : vector<65x9xf32>
    %22 = math.exp %21 : vector<65x9xf32>
    %cst_13 = arith.constant -3.500000e-01 : f32
    %23 = vector.broadcast %cst_13 : f32 to vector<65x9xf32>
    %24 = arith.mulf %23, %19 : vector<65x9xf32>
    %25 = math.exp %24 : vector<65x9xf32>
    %26 = arith.mulf %1, %22 : vector<65x9xf32>
    %27 = arith.mulf %5, %25 : vector<65x9xf32>
    %28 = arith.subf %26, %27 : vector<65x9xf32>
    %29 = arith.mulf %3, %22 : vector<65x9xf32>
    %30 = arith.mulf %7, %25 : vector<65x9xf32>
    %31 = arith.subf %29, %30 : vector<65x9xf32>
    %cst_14 = arith.constant 1.500000e-01 : f32
    %32 = vector.broadcast %cst_14 : f32 to vector<65x9xf32>
    %33 = arith.mulf %32, %18 : vector<65x9xf32>
    %34 = math.exp %33 : vector<65x9xf32>
    %cst_15 = arith.constant 1.500000e-01 : f32
    %35 = vector.broadcast %cst_15 : f32 to vector<65x9xf32>
    %36 = arith.mulf %35, %19 : vector<65x9xf32>
    %37 = math.exp %36 : vector<65x9xf32>
    %38 = arith.subf %34, %37 : vector<65x9xf32>
    %39 = arith.mulf %28, %28 : vector<65x9xf32>
    %40 = vector.shape_cast %39 : vector<65x9xf32> to vector<1x65x9xf32>
    %cst_16 = arith.constant dense<0.000000e+00> : vector<1xf32>
    %41 = vector.multi_reduction <add>, %40, %cst_16 [1, 2] : vector<1x65x9xf32> to vector<1xf32>
    %42 = vector.shape_cast %41 : vector<1xf32> to vector<1x1x1xf32>
    %43 = vector.extract %42[0, 0, 0] : f32 from vector<1x1x1xf32>
    %44 = arith.mulf %31, %31 : vector<65x9xf32>
    %45 = vector.shape_cast %44 : vector<65x9xf32> to vector<1x65x9xf32>
    %cst_17 = arith.constant dense<0.000000e+00> : vector<1xf32>
    %46 = vector.multi_reduction <add>, %45, %cst_17 [1, 2] : vector<1x65x9xf32> to vector<1xf32>
    %47 = vector.shape_cast %46 : vector<1xf32> to vector<1x1x1xf32>
    %48 = vector.extract %47[0, 0, 0] : f32 from vector<1x1x1xf32>
    %49 = arith.mulf %38, %38 : vector<65x9xf32>
    %50 = vector.shape_cast %49 : vector<65x9xf32> to vector<1x65x9xf32>
    %cst_18 = arith.constant dense<0.000000e+00> : vector<1xf32>
    %51 = vector.multi_reduction <add>, %50, %cst_18 [1, 2] : vector<1x65x9xf32> to vector<1xf32>
    %52 = vector.shape_cast %51 : vector<1xf32> to vector<1x1x1xf32>
    %53 = vector.extract %52[0, 0, 0] : f32 from vector<1x1x1xf32>
    %c0_19 = arith.constant 0 : index
    %c0_20 = arith.constant 0 : index
    %54 = vector.load %arg5[%c0_19, %c0_20] : memref<128x65xf32, #tpu.memory_space<vmem>>, vector<128x65xf32>
    %c0_21 = arith.constant 0 : index
    %c0_22 = arith.constant 0 : index
    %55 = vector.load %arg6[%c0_21, %c0_22] : memref<128x65xf32, #tpu.memory_space<vmem>>, vector<128x65xf32>
    %cst_23 = arith.constant dense<0.000000e+00> : vector<128x9xf32>
    %56 = tpu.matmul %54, %1, %cst_23 {dimension_numbers = #tpu.dot_dimension_numbers<[1], [0], [0], [1], [0, 0, 1, 1], [], []>} : vector<128x65xf32>, vector<65x9xf32>, vector<128x9xf32> -> vector<128x9xf32>
    %cst_24 = arith.constant dense<0.000000e+00> : vector<128x9xf32>
    %57 = tpu.matmul %55, %3, %cst_24 {dimension_numbers = #tpu.dot_dimension_numbers<[1], [0], [0], [1], [0, 0, 1, 1], [], []>} : vector<128x65xf32>, vector<65x9xf32>, vector<128x9xf32> -> vector<128x9xf32>
    %58 = arith.addf %56, %57 : vector<128x9xf32>
    %cst_25 = arith.constant dense<0.000000e+00> : vector<128x9xf32>
    %59 = tpu.matmul %54, %5, %cst_25 {dimension_numbers = #tpu.dot_dimension_numbers<[1], [0], [0], [1], [0, 0, 1, 1], [], []>} : vector<128x65xf32>, vector<65x9xf32>, vector<128x9xf32> -> vector<128x9xf32>
    %cst_26 = arith.constant dense<0.000000e+00> : vector<128x9xf32>
    %60 = tpu.matmul %55, %7, %cst_26 {dimension_numbers = #tpu.dot_dimension_numbers<[1], [0], [0], [1], [0, 0, 1, 1], [], []>} : vector<128x65xf32>, vector<65x9xf32>, vector<128x9xf32> -> vector<128x9xf32>
    %61 = arith.addf %59, %60 : vector<128x9xf32>
    %62 = vector.extract_strided_slice %58 {offsets = [64, 0], sizes = [64, 8], strides = [1, 1]} : vector<128x9xf32> to vector<64x8xf32>
    %63 = vector.extract_strided_slice %58 {offsets = [0, 1], sizes = [64, 8], strides = [1, 1]} : vector<128x9xf32> to vector<64x8xf32>
    %64 = arith.addf %62, %63 : vector<64x8xf32>
    %65 = vector.extract_strided_slice %61 {offsets = [64, 0], sizes = [64, 8], strides = [1, 1]} : vector<128x9xf32> to vector<64x8xf32>
    %66 = vector.extract_strided_slice %61 {offsets = [0, 1], sizes = [64, 8], strides = [1, 1]} : vector<128x9xf32> to vector<64x8xf32>
    %67 = arith.addf %65, %66 : vector<64x8xf32>
    %68 = arith.mulf %67, %64 : vector<64x8xf32>
    %69 = vector.shape_cast %68 : vector<64x8xf32> to vector<1x64x8xf32>
    %cst_27 = arith.constant dense<0.000000e+00> : vector<1xf32>
    %70 = vector.multi_reduction <add>, %69, %cst_27 [1, 2] : vector<1x64x8xf32> to vector<1xf32>
    %71 = vector.shape_cast %70 : vector<1xf32> to vector<1x1x1xf32>
    %72 = vector.extract %71[0, 0, 0] : f32 from vector<1x1x1xf32>
    %73 = arith.mulf %67, %67 : vector<64x8xf32>
    %74 = vector.shape_cast %73 : vector<64x8xf32> to vector<1x64x8xf32>
    %cst_28 = arith.constant dense<0.000000e+00> : vector<1xf32>
    %75 = vector.multi_reduction <add>, %74, %cst_28 [1, 2] : vector<1x64x8xf32> to vector<1xf32>
    %76 = vector.shape_cast %75 : vector<1xf32> to vector<1x1x1xf32>
    %77 = vector.extract %76[0, 0, 0] : f32 from vector<1x1x1xf32>
    %cst_29 = arith.constant 9.99999993E-9 : f32
    %78 = arith.addf %77, %cst_29 : f32
    %79 = arith.divf %72, %78 : f32
    %80 = vector.broadcast %79 : f32 to vector<64x8xf32>
    %81 = arith.mulf %80, %67 : vector<64x8xf32>
    %82 = arith.mulf %81, %81 : vector<64x8xf32>
    %83 = vector.shape_cast %82 : vector<64x8xf32> to vector<1x64x8xf32>
    %cst_30 = arith.constant dense<0.000000e+00> : vector<1xf32>
    %84 = vector.multi_reduction <add>, %83, %cst_30 [1, 2] : vector<1x64x8xf32> to vector<1xf32>
    %85 = vector.shape_cast %84 : vector<1xf32> to vector<1x1x1xf32>
    %86 = vector.extract %85[0, 0, 0] : f32 from vector<1x1x1xf32>
    %87 = arith.subf %64, %81 : vector<64x8xf32>
    %88 = arith.subf %64, %81 : vector<64x8xf32>
    %89 = arith.mulf %87, %88 : vector<64x8xf32>
    %90 = vector.shape_cast %89 : vector<64x8xf32> to vector<1x64x8xf32>
    %cst_31 = arith.constant dense<0.000000e+00> : vector<1xf32>
    %91 = vector.multi_reduction <add>, %90, %cst_31 [1, 2] : vector<1x64x8xf32> to vector<1xf32>
    %92 = vector.shape_cast %91 : vector<1xf32> to vector<1x1x1xf32>
    %93 = vector.extract %92[0, 0, 0] : f32 from vector<1x1x1xf32>
    %cst_32 = arith.constant 9.99999993E-9 : f32
    %94 = arith.addf %93, %cst_32 : f32
    %95 = arith.divf %86, %94 : f32
    %cst_33 = arith.constant 9.99999993E-9 : f32
    %96 = arith.addf %95, %cst_33 : f32
    %97 = math.log %96 : f32
    %cst_34 = arith.constant 0.000000e+00 : f32
    %98 = arith.subf %cst_34, %97 : f32
    %cst_35 = arith.constant 0.434294492 : f32
    %99 = arith.mulf %98, %cst_35 : f32
    %100 = tpu.iota {dimensions = array<i32: 0>} : vector<8x128xi32>
    %c0_i32 = arith.constant 0 : i32
    %101 = vector.broadcast %c0_i32 : i32 to vector<8x128xi32>
    %102 = arith.cmpi eq, %100, %101 : vector<8x128xi32>
    %c1_i32 = arith.constant 1 : i32
    %103 = vector.broadcast %c1_i32 : i32 to vector<8x128xi32>
    %104 = arith.cmpi eq, %100, %103 : vector<8x128xi32>
    %c2_i32 = arith.constant 2 : i32
    %105 = vector.broadcast %c2_i32 : i32 to vector<8x128xi32>
    %106 = arith.cmpi eq, %100, %105 : vector<8x128xi32>
    %c3_i32 = arith.constant 3 : i32
    %107 = vector.broadcast %c3_i32 : i32 to vector<8x128xi32>
    %108 = arith.cmpi eq, %100, %107 : vector<8x128xi32>
    %cst_36 = arith.constant 0.000000e+00 : f32
    %109 = vector.broadcast %99 : f32 to vector<8x128xf32>
    %110 = vector.broadcast %cst_36 : f32 to vector<8x128xf32>
    %111 = arith.select %108, %109, %110 : vector<8x128xi1>, vector<8x128xf32>
    %112 = vector.broadcast %53 : f32 to vector<8x128xf32>
    %113 = arith.select %106, %112, %111 : vector<8x128xi1>, vector<8x128xf32>
    %114 = vector.broadcast %48 : f32 to vector<8x128xf32>
    %115 = arith.select %104, %114, %113 : vector<8x128xi1>, vector<8x128xf32>
    %116 = vector.broadcast %43 : f32 to vector<8x128xf32>
    %117 = arith.select %102, %116, %115 : vector<8x128xi1>, vector<8x128xf32>
    %c0_37 = arith.constant 0 : index
    %c0_38 = arith.constant 0 : index
    %c0_39 = arith.constant 0 : index
    %118 = vector.load %arg7[%c0_37, %c0_38, %c0_39] : memref<1x8x128xf32, #tpu.memory_space<vmem>>, vector<1x8x128xf32>
    %119 = vector.shape_cast %118 : vector<1x8x128xf32> to vector<8x128xf32>
    %120 = vector.shape_cast %117 : vector<8x128xf32> to vector<1x8x128xf32>
    tpu.vector_store %arg7[%c0_37, %c0_38, %c0_39], %120 {strides = array<i32>} : memref<1x8x128xf32, #tpu.memory_space<vmem>>, vector<1x8x128xf32>,
    return
  }
  func.func @transform_0(%arg0: i32) -> (i32, i32, i32) {
    %c0_i32 = arith.constant 0 : i32
    %c0_i32_0 = arith.constant 0 : i32
    %c0_i32_1 = arith.constant 0 : i32
    return %arg0, %c0_i32, %c0_i32_0 : i32, i32, i32
  }
  func.func @transform_1(%arg0: i32) -> (i32, i32, i32) {
    %c0_i32 = arith.constant 0 : i32
    %c0_i32_0 = arith.constant 0 : i32
    %c0_i32_1 = arith.constant 0 : i32
    return %arg0, %c0_i32, %c0_i32_0 : i32, i32, i32
  }
  func.func @transform_2(%arg0: i32) -> (i32, i32, i32) {
    %c0_i32 = arith.constant 0 : i32
    %c0_i32_0 = arith.constant 0 : i32
    %c0_i32_1 = arith.constant 0 : i32
    return %arg0, %c0_i32, %c0_i32_0 : i32, i32, i32
  }
  func.func @transform_3(%arg0: i32) -> (i32, i32, i32) {
    %c0_i32 = arith.constant 0 : i32
    %c0_i32_0 = arith.constant 0 : i32
    %c0_i32_1 = arith.constant 0 : i32
    return %arg0, %c0_i32, %c0_i32_0 : i32, i32, i32
  }
  func.func @transform_4(%arg0: i32) -> (i32, i32) {
    %c0_i32 = arith.constant 0 : i32
    %c0_i32_0 = arith.constant 0 : i32
    %c0_i32_1 = arith.constant 0 : i32
    return %c0_i32, %c0_i32_0 : i32, i32
  }
  func.func @transform_5(%arg0: i32) -> (i32, i32) {
    %c0_i32 = arith.constant 0 : i32
    %c0_i32_0 = arith.constant 0 : i32
    %c0_i32_1 = arith.constant 0 : i32
    return %c0_i32, %c0_i32_0 : i32, i32
  }
  func.func @transform_6(%arg0: i32) -> (i32, i32, i32) {
    %c0_i32 = arith.constant 0 : i32
    %c0_i32_0 = arith.constant 0 : i32
    %c0_i32_1 = arith.constant 0 : i32
    return %arg0, %c0_i32, %c0_i32_0 : i32, i32, i32
  }
}

</mosaic_0001>

<bundles_post_ra>
// kernel: loss_hybrid.1
= control target key start
LH: loop header
LB: loop body
LE: loop exit
PB: predicated region body
PF: predicated region fallthrough
CT: control target
= control target key end

     0   :  { %s2435_s21 = smov 0   ;;  %s3263_s0 = inlined_call_operand.vmem [shape: f32[2,65,9], index: 0, kind: input, shape index: {}]   ;;  %s3264_s1 = inlined_call_operand.vmem [shape: f32[2,65,9], index: 1, kind: input, shape index: {}]   ;;  %s3265_s2 = inlined_call_operand.vmem [shape: f32[2,65,9], index: 2, kind: input, shape index: {}]   ;;  %s3266_s3 = inlined_call_operand.vmem [shape: f32[2,65,9], index: 3, kind: input, shape index: {}]   ;;  %s3267_s4 = inlined_call_operand.vmem [shape: f32[128,65], index: 4, kind: input, shape index: {}]   ;;  %s3268_s5 = inlined_call_operand.vmem [shape: f32[128,65], index: 5, kind: input, shape index: {}]   ;;  %s3269_s6 = inlined_call_operand.vmem [shape: f32[2,8,128], index: 6, kind: output, shape index: {}]  }
   0x1 LB: > { %s1801_s22 = sadd.s32 4294967295, %s2397_s21   ;;  %p1805_p0 = scmp.ge.s32.totalorder %s2397_s21, 1  ;;  %s2397_s21 = sphi %s2435_s21, %s16_s21  }
   0x2   : > { %p242_p1 = scmp.lt.s32.totalorder %s2397_s21, 3 }
   0x4   : > { %p243_p2 = pnand %p1805_p0, %p242_p1 }
   0x6   : > { %246 = sbr.rel (%p243_p2) target bundleno = 1078 (0x436), region = 44 }
   0xd   : > { %p286_p3 = scmp.lt.s32.totalorder %s1801_s22, 1  ;;  %v748_v0 = vld [vmem:[%s3268_s5] sm:$0xff]  ;;  %vm764_vm0 = vcmask 531456   ;;  %vm813_vm1 = vcmask 1040384   ;;  %vm634_vm2 = vcmask 72704   ;;  %vm650_vm3 = vcmask 65536  }
   0xe   : > { %1999 = vmatprep.mubr.msk.f32.mxu0 %vm764_vm0, %v748_v0  ;;  %2083 = vmatprep.mubr.msk.f32.mxu1 %vm764_vm0, %v748_v0  ;;  %vm1542_vm4 = vcmask 64512  }
   0xf   : > { %s3297_s22 = smov (!%p286_p3, %s1801_s22), 1 }
  0x10   : > { %s2245_s25 = smul.u32 72, %s3297_s22  ;;  %s1810_s14 = sshll.u32 %s3297_s22, 3 }
  0x11   : > { %s309_s16 = scalar_lea.vmem %s3269_s6, %s1810_s14 }
  0x12   : > { %s2454_s28 = scalar_lea.vmem %s3263_s0, %s2245_s25  ;;  %s2459_s7 = scalar_lea.vmem %s3264_s1, %s2245_s25 }
  0x13   : > { %v2462_v1 = vld [vmem:[%s2454_s28] sm:$0xff]  ;;  %v2465_v2 = vld [vmem:[%s2454_s28 + $0x8] sm:$0xff]  ;;  %s2473_s10 = scalar_lea.vmem %s3265_s2, %s2245_s25  ;;  %s2478_s13 = scalar_lea.vmem %s3266_s3, %s2245_s25  ;;  %v2510_v16 = vld [vmem:[%s2459_s7 + $0x10] sm:$0xff] }
  0x14   : > { %v2468_v3 = vld [vmem:[%s2459_s7] sm:$0xff]  ;;  %v2481_v4 = vld [vmem:[%s2459_s7 + $0x8] sm:$0xff]  ;;  %v346_v5 = vmul.f32 %v2462_v1, %v2462_v1  ;;  %v347_v6 = vmul.f32 %v2465_v2, %v2465_v2  ;;  %v2519_v21 = vld [vmem:[%s2459_s7 + $0x18] sm:$0xff]  ;;  %v357_v42 = vmul.f32 %v2510_v16, %v2510_v16 }
  0x15   : > { %v355_v7 = vmul.f32 %v2468_v3, %v2468_v3  ;;  %v2490_v8 = vld [vmem:[%s2473_s10] sm:$0xff]  ;;  %v2493_v9 = vld [vmem:[%s2473_s10 + $0x8] sm:$0xff]  ;;  %v356_v10 = vmul.f32 %v2481_v4, %v2481_v4  ;;  %v2149_v11 = vpack.c.bf16 %v2481_v4, %v2468_v3  ;;  %v2522_v22 = vld [vmem:[%s2478_s13 + $0x10] sm:$0xff]  ;;  %v2153_v25 = vpack.c.bf16 %v2519_v21, %v2510_v16 }
  0x16   : > { %v2500_v12 = vld [vmem:[%s2478_s13] sm:$0xff]  ;;  %v2503_v13 = vld [vmem:[%s2478_s13 + $0x8] sm:$0xff]  ;;  %v382_v14 = vmul.f32 %v2490_v8, %v2490_v8  ;;  %v383_v15 = vmul.f32 %v2493_v9, %v2493_v9  ;;  %v2525_v23 = vld [vmem:[%s2478_s13 + $0x18] sm:$0xff]  ;;  %v358_v44 = vmul.f32 %v2519_v21, %v2519_v21  ;;  %v393_v45 = vmul.f32 %v2522_v22, %v2522_v22 }
  0x17   : > { %v364_v17 = vadd.f32 %v355_v7, %v346_v5  ;;  %v391_v18 = vmul.f32 %v2500_v12, %v2500_v12  ;;  %v392_v19 = vmul.f32 %v2503_v13, %v2503_v13  ;;  %v2181_v20 = vpack.c.bf16 %v2503_v13, %v2500_v12  ;;  %2150 = vmatprep.subr.bf16.mxu0 %v2149_v11  ;;  %v2530_v29 = vld [vmem:[%s2459_s7 + $0x20] sm:$0xff]  ;;  %v2533_v30 = vld [vmem:[%s2459_s7 + $0x28] sm:$0xff]  ;;  %v2544_v37 = vld [vmem:[%s2459_s7 + $0x30] sm:$0xff] }
  0x18   : > { %v365_v24 = vadd.f32 %v356_v10, %v347_v6  ;;  %2152 = vmatpush3.bf16.msra.mxu0 %v2149_v11  ;;  %3278 = vst [vmem:[#allocation2_spill] sm:$0xff] %v2533_v30  ;;  %v2185_v32 = vpack.c.bf16 %v2525_v23, %v2522_v22  ;;  %v2538_v33 = vld [vmem:[%s2478_s13 + $0x20] sm:$0xff]  ;;  %v2541_v34 = vld [vmem:[%s2478_s13 + $0x28] sm:$0xff]  ;;  %3280 = vst [vmem:[#allocation4_spill] sm:$0xff] %v2544_v37  ;;  %v2157_v39 = vpack.c.bf16 %v2533_v30, %v2530_v29 }
  0x19   : > { %v373_v26 = vadd.f32 1e-12, %v364_v17  ;;  %v400_v27 = vadd.f32 %v391_v18, %v382_v14  ;;  %v401_v28 = vadd.f32 %v392_v19, %v383_v15  ;;  %2182 = vmatprep.subr.bf16.mxu1 %v2181_v20  ;;  %2154 = vmatprep.subr.bf16.mxu0 %v2153_v25  ;;  %3279 = vst [vmem:[#allocation3_spill] sm:$0xff] %v2541_v34  ;;  %v2547_v38 = vld [vmem:[%s2459_s7 + $0x38] sm:$0xff]  ;;  %v2552_v40 = vld [vmem:[%s2478_s13 + $0x30] sm:$0xff]  ;;  %v2594_v58 = vld [vmem:[%s2454_s28 + $0x20] sm:$0xff] }
  0x1a   : > { %v374_v31 = vadd.f32 1e-12, %v365_v24  ;;  %2184 = vmatpush3.bf16.msra.mxu1 %v2181_v20  ;;  %3281 = vst [vmem:[#allocation5_spill] sm:$0xff] %v2547_v38  ;;  %3282 = vst [vmem:[#allocation6_spill] sm:$0xff] %v2552_v40  ;;  %v2555_v41 = vld [vmem:[%s2478_s13 + $0x38] sm:$0xff]  ;;  %v2189_v43 = vpack.c.bf16 %v2541_v34, %v2538_v33  ;;  %v2161_v46 = vpack.c.bf16 %v2547_v38, %v2544_v37  ;;  %v2574_v50 = vld [vmem:[%s2454_s28 + $0x10] sm:$0xff] }
  0x1b   : > { %2275 = vlog2.f32 %v373_v26  ;;  %v409_v35 = vadd.f32 1e-12, %v400_v27  ;;  %v410_v36 = vadd.f32 1e-12, %v401_v28  ;;  %2186 = vmatprep.subr.bf16.mxu1 %v2185_v32  ;;  %3283 = vst [vmem:[#allocation7_spill] sm:$0xff] %v2555_v41  ;;  %v394_v47 = vmul.f32 %v2525_v23, %v2525_v23  ;;  %v2577_v51 = vld [vmem:[%s2454_s28 + $0x18] sm:$0xff] }
  0x1c   : > { %2277 = vlog2.f32 %v374_v31  ;;  %2156 = vmatpush3.bf16.msra.mxu0 %v2153_v25  ;;  %v359_v48 = vmul.f32 %v2530_v29, %v2530_v29  ;;  %v2193_v49 = vpack.c.bf16 %v2555_v41, %v2552_v40  ;;  %v2580_v52 = vld [vmem:[%s2473_s10 + $0x10] sm:$0xff]  ;;  %v360_v53 = vmul.f32 %v2533_v30, %v2533_v30  ;;  %v2589_v56 = vld [vmem:[%s2473_s10 + $0x18] sm:$0xff]  ;;  %v2597_v59 = vld [vmem:[%s2454_s28 + $0x28] sm:$0xff] }
  0x1d   : > { %2279 = vlog2.f32 %v409_v35  ;;  %2158 = vmatprep.subr.bf16.mxu0 %v2157_v39  ;;  %v348_v54 = vmul.f32 %v2574_v50, %v2574_v50  ;;  %v349_v55 = vmul.f32 %v2577_v51, %v2577_v51  ;;  %v384_v57 = vmul.f32 %v2580_v52, %v2580_v52  ;;  %v2606_v6 = vld [vmem:[%s2459_s7 + $0x40] sm:$0x1] }
  0x1e   : > { %2281 = vlog2.f32 %v410_v36  ;;  %2188 = vmatpush3.bf16.msra.mxu1 %v2185_v32  ;;  %v385_v60 = vmul.f32 %v2589_v56, %v2589_v56  ;;  %v350_v61 = vmul.f32 %v2594_v58, %v2594_v58  ;;  %v351_v62 = vmul.f32 %v2597_v59, %v2597_v59  ;;  %v2609_v7 = vld [vmem:[%s2478_s13 + $0x40] sm:$0x1] }
  0x1f   : > { %2190 = vmatprep.subr.bf16.mxu1 %v2189_v43  ;;  %v366_v63 = vadd.f32 %v357_v42, %v348_v54  ;;  %v367_v0 = vadd.f32 %v358_v44, %v349_v55  ;;  %v402_v5 = vadd.f32 %v393_v45, %v384_v57  ;;  %v395_v20 = vmul.f32 %v2538_v33, %v2538_v33  ;;  %v2624_v32 = vld [vmem:[%s2473_s10 + $0x20] sm:$0xff] }
  0x20   : > { %2160 = vmatpush3.bf16.msra.mxu0 %v2157_v39  ;;  %v403_v10 = vadd.f32 %v394_v47, %v385_v60  ;;  %v368_v11 = vadd.f32 %v359_v48, %v350_v61  ;;  %v369_v18 = vadd.f32 %v360_v53, %v351_v62  ;;  %v2165_v24 = vpack.c.bf16 %v2465_v2, %v2462_v1  ;;  %v749_v39 = vld [vmem:[%s3268_s5 + $0x8] sm:$0xff]  ;;  %v750_v60 = vld [vmem:[%s3268_s5 + $0x10] sm:$0xff] }
  0x21   : > { %2162 = vmatprep.subr.bf16.mxu0 %v2161_v46  ;;  %v375_v14 = vadd.f32 1e-12, %v366_v63  ;;  %v376_v15 = vadd.f32 1e-12, %v367_v0  ;;  %v411_v17 = vadd.f32 1e-12, %v402_v5  ;;  %v396_v28 = vmul.f32 %v2541_v34, %v2541_v34 }
  0x22   : > { %2192 = vmatpush3.bf16.msra.mxu1 %v2189_v43  ;;  %v412_v25 = vadd.f32 1e-12, %v403_v10  ;;  %v2197_v31 = vpack.c.bf16 %v2493_v9, %v2490_v8  ;;  %v377_v42 = vadd.f32 1e-12, %v368_v11  ;;  %v2634_v43 = vld [vmem:[%s2473_s10 + $0x28] sm:$0xff]  ;;  %v386_v44 = vmul.f32 %v2624_v32, %v2624_v32  ;;  %v751_v63 = vld [vmem:[%s3268_s5 + $0x18] sm:$0xff] }
  0x23   : > { %2194 = vmatprep.subr.bf16.mxu1 %v2193_v49  ;;  %2283 = vlog2.f32 %v375_v14  ;;  %v378_v48 = vadd.f32 1e-12, %v369_v18  ;;  %v387_v54 = vmul.f32 %v2634_v43, %v2634_v43  ;;  %v752_v5 = vld [vmem:[%s3268_s5 + $0x20] sm:$0xff]  ;;  %v2169_v10 = vpack.c.bf16 %v2577_v51, %v2574_v50  ;;  %v753_v18 = vld [vmem:[%s3268_s5 + $0x28] sm:$0xff] }
  0x24   : > { %2164 = vmatpush3.bf16.msra.mxu0 %v2161_v46  ;;  %2285 = vlog2.f32 %v376_v15  ;;  %v404_v11 = vadd.f32 %v395_v20, %v386_v44  ;;  %v2201_v15 = vpack.c.bf16 %v2589_v56, %v2580_v52  ;;  %v754_v20 = vld [vmem:[%s3268_s5 + $0x30] sm:$0xff] }
  0x25   : > { %v2276_v19 = vpop.eup %2275  ;;  %1997 = vmatprep.subr.msk.mxu0 %vm813_vm1, %v2606_v6  ;;  %2287 = vlog2.f32 %v411_v17  ;;  %v405_v17 = vadd.f32 %v396_v28, %v387_v54 }
  0x26   : > { %v2278_v26 = vpop.eup %2277  ;;  %v2615_v27 = vmul.f32 0.6931472, %v2276_v19  ;;  %2196 = vmatpush3.bf16.msra.mxu1 %v2193_v49  ;;  %2289 = vlog2.f32 %v412_v25  ;;  %v413_v25 = vadd.f32 1e-12, %v404_v11 }
  0x27   : > { %v2280_v35 = vpop.eup %2279  ;;  %v2626_v36 = vmul.f32 0.6931472, %v2278_v26  ;;  %2081 = vmatprep.subr.msk.mxu1 %vm813_vm1, %v2609_v7  ;;  %2291 = vlog2.f32 %v377_v42  ;;  %v2689_v42 = vld [vmem:[%s2454_s28 + $0x38] sm:$0xff] }
  0x28   : > { %v2282_v45 = vpop.eup %2281  ;;  %v454_v46 = vmul.f32 -0.35, %v2615_v27  ;;  %v2639_v47 = vmul.f32 0.6931472, %v2280_v35  ;;  %1998 = vmatpush3.msk.msra.mxu0 %vm813_vm1, %v2606_v6  ;;  %2293 = vlog2.f32 %v378_v48  ;;  %v2205_v35 = vpack.c.bf16 %v2634_v43, %v2624_v32  ;;  %v2698_v48 = vld [vmem:[%s2473_s10 + $0x38] sm:$0xff] }
  0x29   : > { %v455_v49 = vmul.f32 -0.35, %v2626_v36  ;;  %v2642_v53 = vmul.f32 0.6931472, %v2282_v45  ;;  %2000 = vmatmul.mubr.msk.f32.vlgmr.msra.gmra.mrb[0].mxu0 %vm764_vm0, %v749_v39  ;;  %2166 = vmatprep.subr.bf16.mxu0 %v2165_v24 }
  0x2a   : > { %v463_v55 = vmul.f32 1.442695, %v454_v46  ;;  %v481_v57 = vmul.f32 -0.35, %v2639_v47  ;;  %2082 = vmatpush3.msk.msra.mxu1 %vm813_vm1, %v2609_v7  ;;  %2168 = vmatpush3.bf16.msra.mxu0 %v2165_v24  ;;  %v2173_v24 = vpack.c.bf16 %v2597_v59, %v2594_v58  ;;  %v2695_v46 = vld [vmem:[%s2473_s10 + $0x30] sm:$0xff] }
  0x2b   : > { %v465_v61 = vmul.f32 1.442695, %v455_v49  ;;  %v482_v62 = vmul.f32 -0.35, %v2642_v53  ;;  %2084 = vmatmul.mubr.msk.f32.vlgmr.msra.gmra.mrb[0].mxu1 %vm764_vm0, %v749_v39  ;;  %2198 = vmatprep.subr.bf16.mxu1 %v2197_v31  ;;  %v2686_v39 = vld [vmem:[%s2454_s28 + $0x30] sm:$0xff]  ;;  %v2209_v11 = vpack.c.bf16 %v2698_v48, %v2695_v46 }
  0x2c   : > { %v490_v0 = vmul.f32 1.442695, %v481_v57  ;;  %2200 = vmatpush3.bf16.msra.mxu1 %v2197_v31  ;;  %2002 = vmatprep.mubr.msk.f32.mxu0 %vm764_vm0, %v750_v60  ;;  %2295 = vpow2.f32 %v463_v55  ;;  %v414_v31 = vadd.f32 1e-12, %v405_v17  ;;  %v755_v57 = vld [vmem:[%s3268_s5 + $0x38] sm:$0xff] }
  0x2d   : > { %v492_v14 = vmul.f32 1.442695, %v482_v62  ;;  %2086 = vmatprep.mubr.msk.f32.mxu1 %vm764_vm0, %v750_v60  ;;  %2003 = vmatmul.mubr.msk.f32.gmra.mrb[2].mxu0 %vm764_vm0, %v751_v63  ;;  %2297 = vpow2.f32 %v465_v61  ;;  %v2284_v19 = vpop.eup %2283  ;;  %v756_v62 = vld [vmem:[%s3268_s5 + $0x40] sm:$0xff] }
  0x2e   : > { %2005 = vmatprep.mubr.msk.f32.mxu0 %vm764_vm0, %v752_v5  ;;  %2299 = vpow2.f32 %v490_v0  ;;  %2170 = vmatprep.subr.bf16.mxu0 %v2169_v10  ;;  %v2286_v26 = vpop.eup %2285  ;;  %v2681_v28 = vmul.f32 0.6931472, %v2284_v19  ;;  %v757_v19 = vld [vmem:[%s3268_s5 + $0x48] sm:$0xff] }
  0x2f   : > { %2087 = vmatmul.mubr.msk.f32.gmra.mrb[2].mxu1 %vm764_vm0, %v751_v63  ;;  %2301 = vpow2.f32 %v492_v14  ;;  %2202 = vmatprep.subr.bf16.mxu1 %v2201_v15  ;;  %v2288_v44 = vpop.eup %2287  ;;  %v2691_v45 = vmul.f32 0.6931472, %v2286_v26  ;;  %v2177_v63 = vpack.c.bf16 %v2689_v42, %v2686_v39 }
  0x30   : > { %2089 = vmatprep.mubr.msk.f32.mxu1 %vm764_vm0, %v752_v5  ;;  %2172 = vmatpush3.bf16.msra.mxu0 %v2169_v10  ;;  %v2290_v49 = vpop.eup %2289  ;;  %v456_v54 = vmul.f32 -0.35, %v2681_v28  ;;  %v2701_v55 = vmul.f32 0.6931472, %v2288_v44  ;;  %2303 = vlog2.f32 %v413_v25  ;;  %v758_v25 = vld [vmem:[%s3268_s5 + $0x50] sm:$0xff] }
  0x31   : > { %2006 = vmatmul.mubr.msk.f32.gmra.mrb[4].mxu0 %vm764_vm0, %v753_v18  ;;  %2204 = vmatpush3.bf16.msra.mxu1 %v2201_v15  ;;  %v457_v60 = vmul.f32 -0.35, %v2691_v45  ;;  %v2709_v61 = vmul.f32 0.6931472, %v2290_v49  ;;  %v2292_v0 = vpop.eup %2291  ;;  %2305 = vlog2.f32 %v414_v31  ;;  %v2742_v49 = vld [vmem:[%s2454_s28 + $0x40] sm:$0x1] }
  0x32   : > { %2008 = vmatprep.mubr.msk.f32.mxu0 %vm764_vm0, %v754_v20  ;;  %2174 = vmatprep.subr.bf16.mxu0 %v2173_v24  ;;  %v467_v5 = vmul.f32 1.442695, %v456_v54  ;;  %v483_v10 = vmul.f32 -0.35, %v2701_v55  ;;  %v2294_v14 = vpop.eup %2293 }
  0x33   : > { %2090 = vmatmul.mubr.msk.f32.gmra.mrb[4].mxu1 %vm764_vm0, %v753_v18  ;;  %2206 = vmatprep.subr.bf16.mxu1 %v2205_v35  ;;  %v469_v15 = vmul.f32 1.442695, %v457_v60  ;;  %v484_v17 = vmul.f32 -0.35, %v2709_v61  ;;  %v2739_v44 = vmul.f32 0.6931472, %v2294_v14 }
  0x34   : > { %2092 = vmatprep.mubr.msk.f32.mxu1 %vm764_vm0, %v754_v20  ;;  %2176 = vmatpush3.bf16.msra.mxu0 %v2173_v24  ;;  %2307 = vpow2.f32 %v467_v5  ;;  %v494_v18 = vmul.f32 1.442695, %v483_v10  ;;  %v2750_v60 = vld [vmem:[%s2473_s10 + $0x40] sm:$0x1]  ;;  %s2399_s10 = smov 127  }
  0x35   : > { %2009 = vmatmul.mubr.msk.f32.gmra.mrb[6].mxu0 %vm764_vm0, %v755_v57  ;;  %2208 = vmatpush3.bf16.msra.mxu1 %v2205_v35  ;;  %2309 = vpow2.f32 %v469_v15  ;;  %v496_v24 = vmul.f32 1.442695, %v484_v17  ;;  %v2737_v35 = vmul.f32 0.6931472, %v2292_v0  ;;  %v459_v0 = vmul.f32 -0.35, %v2739_v44 }
  0x36   : > { %2011 = vmatprep.mubr.msk.f32.mxu0 %vm764_vm0, %v756_v62  ;;  %v2727_v20 = vpop.eup %2295  ;;  %2178 = vmatprep.subr.bf16.mxu0 %v2177_v63  ;;  %2311 = vpow2.f32 %v494_v18 }
  0x37   : > { %2093 = vmatmul.mubr.msk.f32.gmra.mrb[6].mxu1 %vm764_vm0, %v755_v57  ;;  %v2733_v26 = vpop.eup %2297  ;;  %v535_v31 = vmul.f32 %v2727_v20, %v2468_v3  ;;  %2210 = vmatprep.subr.bf16.mxu1 %v2209_v11  ;;  %2313 = vpow2.f32 %v496_v24  ;;  %v473_v15 = vmul.f32 1.442695, %v459_v0  ;;  %v761_v24 = vld [vmem:[%s3268_s5 + $0x68] sm:$0xff] }
  0x38   : > { %2095 = vmatprep.mubr.msk.f32.mxu1 %vm764_vm0, %v756_v62  ;;  %2180 = vmatpush3.bf16.msra.mxu0 %v2177_v63  ;;  %v2744_v54 = vpop.eup %2299  ;;  %v536_v57 = vmul.f32 %v2733_v26, %v2481_v4  ;;  %v458_v63 = vmul.f32 -0.35, %v2737_v35  ;;  %v759_v4 = vld [vmem:[%s3268_s5 + $0x58] sm:$0xff] }
  0x39   : > { %2012 = vmatmul.mubr.msk.f32.gmra.mrb[8].mxu0 %vm764_vm0, %v757_v19  ;;  %2212 = vmatpush3.bf16.msra.mxu1 %v2209_v11  ;;  %v2752_v62 = vpop.eup %2301  ;;  %v544_v3 = vmul.f32 %v2744_v54, %v2500_v12  ;;  %v760_v12 = vld [vmem:[%s3268_s5 + $0x60] sm:$0xff] }
  0x3a   : > { %2014 = vmatprep.mubr.msk.f32.mxu0 %vm764_vm0, %v758_v25  ;;  %v545_v5 = vmul.f32 %v2752_v62, %v2503_v13  ;;  %2039 = vmatprep.subr.msk.mxu0 %vm813_vm1, %v2742_v49  ;;  %v471_v11 = vmul.f32 1.442695, %v458_v63  ;;  %v2304_v14 = vpop.eup %2303 }
  0x3b   : > { %2096 = vmatmul.mubr.msk.f32.gmra.mrb[8].mxu1 %vm764_vm0, %v757_v19  ;;  %v553_v10 = vsub.f32 %v535_v31, %v544_v3  ;;  %2123 = vmatprep.subr.msk.mxu1 %vm813_vm1, %v2750_v60  ;;  %v2306_v17 = vpop.eup %2305  ;;  %v2778_v19 = vmul.f32 0.6931472, %v2304_v14 }
  0x3c   : > { %2098 = vmatprep.mubr.msk.f32.mxu1 %vm764_vm0, %v758_v25  ;;  %2040 = vmatpush3.msk.msra.mxu0 %vm813_vm1, %v2742_v49  ;;  %v554_v13 = vsub.f32 %v536_v57, %v545_v5  ;;  %v2785_v31 = vmul.f32 0.6931472, %v2306_v17  ;;  %v762_v57 = vld [vmem:[%s3268_s5 + $0x70] sm:$0xff]  ;;  %2315 = vpow2.f32 %v471_v11  ;;  %v763_v11 = vld [vmem:[%s3268_s5 + $0x78] sm:$0xff] }
  0x3d   : > { %2015 = vmatmul.mubr.msk.f32.gmra.mrb[10].mxu0 %vm764_vm0, %v759_v4  ;;  %2124 = vmatpush3.msk.msra.mxu1 %vm813_vm1, %v2750_v60  ;;  %v662_v18 = vmul.f32 %v553_v10, %v553_v10  ;;  %v485_v0 = vmul.f32 -0.35, %v2778_v19  ;;  %2317 = vpow2.f32 %v473_v15  ;;  %v732_v15 = vld [vmem:[%s3267_s4] sm:$0xff] }
  0x3e   : > { %2017 = vmatprep.mubr.msk.f32.mxu0 %vm764_vm0, %v760_v12  ;;  %v663_v25 = vmul.f32 %v554_v13, %v554_v13  ;;  %v2791_v3 = vpop.eup %2307  ;;  %v486_v10 = vmul.f32 -0.35, %v2785_v31 }
  0x3f   : > { %2099 = vmatmul.mubr.msk.f32.gmra.mrb[10].mxu1 %vm764_vm0, %v759_v4  ;;  %v671_v63 = vsel %vm634_vm2, %v662_v18, 0.0  ;;  %v2795_v4 = vpop.eup %2309  ;;  %v498_v14 = vmul.f32 1.442695, %v485_v0  ;;  %v510_v13 = vmul.f32 %v2791_v3, %v2574_v50 }
  0x40   : > { %2101 = vmatprep.mubr.msk.f32.mxu1 %vm764_vm0, %v760_v12  ;;  %v672_v5 = vsel %vm634_vm2, %v663_v25, 0.0  ;;  %v500_v17 = vmul.f32 1.442695, %v486_v10  ;;  %v2813_v18 = vpop.eup %2311 }
  0x41   : > { %2018 = vmatmul.mubr.msk.f32.gmra.mrb[12].mxu0 %vm764_vm0, %v761_v24  ;;  %v2800_v12 = vadd.f32 %v672_v5, %v671_v63  ;;  %2319 = vpow2.f32 %v498_v14  ;;  %v2817_v25 = vpop.eup %2313  ;;  %v519_v63 = vmul.f32 %v2813_v18, %v2580_v52  ;;  %v734_v52 = vld [vmem:[%s3267_s4 + $0x10] sm:$0xff]  ;;  %v735_v5 = vld [vmem:[%s3267_s4 + $0x18] sm:$0xff]  ;;  %v736_v14 = vld [vmem:[%s3267_s4 + $0x20] sm:$0xff] }
  0x42   : > { %2020 = vmatprep.mubr.msk.f32.mxu0 %vm764_vm0, %v762_v57  ;;  %2321 = vpow2.f32 %v500_v17  ;;  %v520_v50 = vmul.f32 %v2817_v25, %v2589_v56 }
  0x43   : > { %3284 = vst [vmem:[#allocation8_spill] sm:$0xff] %v2800_v12  ;;  %2102 = vmatmul.mubr.msk.f32.gmra.mrb[12].mxu1 %vm764_vm0, %v761_v24  ;;  %v511_v24 = vmul.f32 %v2795_v4, %v2577_v51  ;;  %v733_v51 = vld [vmem:[%s3267_s4 + $0x8] sm:$0xff] }
  0x44   : > { %2104 = vmatprep.mubr.msk.f32.mxu1 %vm764_vm0, %v762_v57  ;;  %v2829_v57 = vsub.f32 %v510_v13, %v519_v63  ;;  %v738_v63 = vld [vmem:[%s3267_s4 + $0x30] sm:$0xff] }
  0x45   : > { %2021 = vmatmul.mubr.msk.f32.gmra.mrb[14].mxu0 %vm764_vm0, %v763_v11  ;;  %v2835_v0 = vsub.f32 %v511_v24, %v520_v50 }
  0x46   : > { %2041 = vmatprep.mubr.msk.f32.mxu0 %vm764_vm0, %v732_v15  ;;  %v2838_v56 = vpop.eup %2315 }
  0x47   : > { %2105 = vmatmul.mubr.msk.f32.gmra.mrb[14].mxu1 %vm764_vm0, %v763_v11  ;;  %v2845_v10 = vpop.eup %2317  ;;  %v512_v11 = vmul.f32 %v2838_v56, %v2594_v58 }
  0x48   : > { %2125 = vmatprep.mubr.msk.f32.mxu1 %vm764_vm0, %v732_v15  ;;  %3285 = vst [vmem:[#allocation9_spill] sm:$0xff] %v2845_v10  ;;  %v513_v17 = vmul.f32 %v2845_v10, %v2597_v59  ;;  %v737_v15 = vld [vmem:[%s3267_s4 + $0x28] sm:$0xff]  ;;  %v562_v10 = vmul.f32 0.15, %v2615_v27  ;;  %v591_v27 = vmul.f32 0.15, %v2701_v55 }
  0x49   : > { %2042 = vmatmul.mubr.msk.f32.vlgmr.msra.gmra.mrb[0].mxu0 %vm764_vm0, %v733_v51 }
  0x4a   : > { %2044 = vmatprep.mubr.msk.f32.mxu0 %vm764_vm0, %v734_v52 }
  0x4b   : > { %2126 = vmatmul.mubr.msk.f32.vlgmr.msra.gmra.mrb[0].mxu1 %vm764_vm0, %v733_v51  ;;  %v2854_v13 = vpop.eup %2319 }
  0x4c   : > { %2128 = vmatprep.mubr.msk.f32.mxu1 %vm764_vm0, %v734_v52  ;;  %v2863_v24 = vpop.eup %2321  ;;  %v521_v58 = vmul.f32 %v2854_v13, %v2624_v32  ;;  %v739_v32 = vld [vmem:[%s3267_s4 + $0x38] sm:$0xff]  ;;  %v741_v52 = vld [vmem:[%s3267_s4 + $0x48] sm:$0xff] }
  0x4d   : > { %2045 = vmatmul.mubr.msk.f32.gmra.mrb[2].mxu0 %vm764_vm0, %v735_v5  ;;  %3286 = vst [vmem:[#allocation10_spill] sm:$0xff] %v2863_v24  ;;  %v522_v59 = vmul.f32 %v2863_v24, %v2634_v43  ;;  %v740_v43 = vld [vmem:[%s3267_s4 + $0x40] sm:$0xff] }
  0x4e   : > { %2047 = vmatprep.mubr.msk.f32.mxu0 %vm764_vm0, %v736_v14  ;;  %v2873_v50 = vsub.f32 %v512_v11, %v521_v58  ;;  %v744_v11 = vld [vmem:[%s3267_s4 + $0x60] sm:$0xff]  ;;  %v747_v58 = vld [vmem:[%s3267_s4 + $0x78] sm:$0xff] }
  0x4f   : > { %2129 = vmatmul.mubr.msk.f32.gmra.mrb[2].mxu1 %vm764_vm0, %v735_v5  ;;  %v2876_v51 = vsub.f32 %v513_v17, %v522_v59  ;;  %v742_v5 = vld [vmem:[%s3267_s4 + $0x50] sm:$0xff]  ;;  %v745_v17 = vld [vmem:[%s3267_s4 + $0x68] sm:$0xff]  ;;  %v352_v59 = vmul.f32 %v2686_v39, %v2686_v39 }
  0x50   : > { %2131 = vmatprep.mubr.msk.f32.mxu1 %vm764_vm0, %v736_v14  ;;  %v743_v14 = vld [vmem:[%s3267_s4 + $0x58] sm:$0xff] }
  0x51   : > { %2048 = vmatmul.mubr.msk.f32.gmra.mrb[4].mxu0 %vm764_vm0, %v737_v15 }
  0x52   : > { %2050 = vmatprep.mubr.msk.f32.mxu0 %vm764_vm0, %v738_v63 }
  0x53   : > { %2132 = vmatmul.mubr.msk.f32.gmra.mrb[4].mxu1 %vm764_vm0, %v737_v15  ;;  %v746_v15 = vld [vmem:[%s3267_s4 + $0x70] sm:$0xff] }
  0x54   : > { %2134 = vmatprep.mubr.msk.f32.mxu1 %vm764_vm0, %v738_v63  ;;  %v361_v63 = vmul.f32 %v2544_v37, %v2544_v37 }
  0x55   : > { %2051 = vmatmul.mubr.msk.f32.gmra.mrb[6].mxu0 %vm764_vm0, %v739_v32 }
  0x56   : > { %2053 = vmatprep.mubr.msk.f32.mxu0 %vm764_vm0, %v740_v43 }
  0x57   : > { %2135 = vmatmul.mubr.msk.f32.gmra.mrb[6].mxu1 %vm764_vm0, %v739_v32  ;;  %v397_v32 = vmul.f32 %v2552_v40, %v2552_v40 }
  0x58   : > { %2137 = vmatprep.mubr.msk.f32.mxu1 %vm764_vm0, %v740_v43  ;;  %v388_v43 = vmul.f32 %v2695_v46, %v2695_v46 }
  0x59   : > { %2054 = vmatmul.mubr.msk.f32.gmra.mrb[8].mxu0 %vm764_vm0, %v741_v52 }
  0x5a   : > { %2056 = vmatprep.mubr.msk.f32.mxu0 %vm764_vm0, %v742_v5 }
  0x5b   : > { %2138 = vmatmul.mubr.msk.f32.gmra.mrb[8].mxu1 %vm764_vm0, %v741_v52  ;;  %v362_v52 = vmul.f32 %v2547_v38, %v2547_v38 }
  0x5c   : > { %2140 = vmatprep.mubr.msk.f32.mxu1 %vm764_vm0, %v742_v5  ;;  %v353_v5 = vmul.f32 %v2689_v42, %v2689_v42 }
  0x5d   : > { %2057 = vmatmul.mubr.msk.f32.gmra.mrb[10].mxu0 %vm764_vm0, %v743_v14 }
  0x5e   : > { %2059 = vmatprep.mubr.msk.f32.mxu0 %vm764_vm0, %v744_v11 }
  0x5f   : > { %2141 = vmatmul.mubr.msk.f32.gmra.mrb[10].mxu1 %vm764_vm0, %v743_v14  ;;  %v398_v14 = vmul.f32 %v2555_v41, %v2555_v41  ;;  %v563_v41 = vmul.f32 0.15, %v2626_v36 }
  0x60   : > { %2143 = vmatprep.mubr.msk.f32.mxu1 %vm764_vm0, %v744_v11  ;;  %v370_v11 = vadd.f32 %v361_v63, %v352_v59  ;;  %v589_v59 = vmul.f32 0.15, %v2639_v47 }
  0x61   : > { %2060 = vmatmul.mubr.msk.f32.gmra.mrb[12].mxu0 %vm764_vm0, %v745_v17 }
  0x62   : > { %2062 = vmatprep.mubr.msk.f32.mxu0 %vm764_vm0, %v746_v15  ;;  %v379_v12 = vadd.f32 1e-12, %v370_v11 }
  0x63   : > { %2144 = vmatmul.mubr.msk.f32.gmra.mrb[12].mxu1 %vm764_vm0, %v745_v17  ;;  %v389_v17 = vmul.f32 %v2698_v48, %v2698_v48 }
  0x64   : > { %2146 = vmatprep.mubr.msk.f32.mxu1 %vm764_vm0, %v746_v15  ;;  %v406_v15 = vadd.f32 %v397_v32, %v388_v43  ;;  %2323 = vlog2.f32 %v379_v12  ;;  %v590_v32 = vmul.f32 0.15, %v2642_v53  ;;  %v564_v12 = vmul.f32 0.15, %v2681_v28 }
  0x65   : > { %2063 = vmatmul.mubr.msk.f32.gmra.mrb[14].mxu0 %vm764_vm0, %v747_v58  ;;  %v407_v40 = vadd.f32 %v398_v14, %v389_v17 }
  0x66   : > { %v415_v37 = vadd.f32 1e-12, %v406_v15  ;;  %v600_v14 = vmul.f32 1.442695, %v590_v32  ;;  %v575_v17 = vmul.f32 1.442695, %v564_v12  ;;  %v363_v32 = vmul.f32 %v2606_v6, %v2606_v6 }
  0x67   : > { %2147 = vmatmul.mubr.msk.f32.gmra.mrb[14].mxu1 %vm764_vm0, %v747_v58  ;;  %v371_v58 = vadd.f32 %v362_v52, %v353_v5  ;;  %v416_v34 = vadd.f32 1e-12, %v407_v40  ;;  %v571_v5 = vmul.f32 1.442695, %v562_v10  ;;  %v573_v40 = vmul.f32 1.442695, %v563_v41 }
  0x68   : > { %2325 = vlog2.f32 %v415_v37  ;;  %v565_v37 = vmul.f32 0.15, %v2691_v45  ;;  %v602_v41 = vmul.f32 1.442695, %v591_v27  ;;  %v399_v12 = vmul.f32 %v2609_v7, %v2609_v7 }
  0x69   : > { %v380_v24 = vadd.f32 1e-12, %v371_v58  ;;  %v567_v58 = vmul.f32 0.15, %v2739_v44  ;;  %v390_v6 = vmul.f32 %v2750_v60, %v2750_v60 }
  0x6a   : > { %v577_v53 = vmul.f32 1.442695, %v565_v37 }
  0x6b   : > { %2327 = vlog2.f32 %v380_v24  ;;  %v598_v24 = vmul.f32 1.442695, %v589_v59 }
  0x6c   : > { %2329 = vlog2.f32 %v416_v34 }
  0x6d   : > { %2331 = vpow2.f32 %v571_v5  ;;  %v593_v5 = vmul.f32 0.15, %v2778_v19 }
  0x6e   : > { %v2324_v38 = vpop.eup %2323  ;;  %2333 = vpow2.f32 %v573_v40  ;;  %v581_v40 = vmul.f32 1.442695, %v567_v58 }
  0x6f   : > { %v431_v43 = vmul.f32 0.6931472, %v2324_v38  ;;  %v592_v38 = vmul.f32 0.15, %v2709_v61  ;;  %2335 = vpow2.f32 %v598_v24  ;;  %v354_v24 = vmul.f32 %v2742_v49, %v2742_v49 }
  0x70   : > { %2337 = vpow2.f32 %v600_v14  ;;  %v606_v19 = vmul.f32 1.442695, %v593_v5 }
  0x71   : > { %v460_v11 = vmul.f32 -0.35, %v431_v43  ;;  %2339 = vpow2.f32 %v575_v17  ;;  %v604_v55 = vmul.f32 1.442695, %v592_v38  ;;  %v568_v37 = vmul.f32 0.15, %v431_v43 }
  0x72   : > { %v2326_v63 = vpop.eup %2325  ;;  %2341 = vpow2.f32 %v577_v53  ;;  %v627_v38 = vmul.f32 %v2829_v57, %v2829_v57  ;;  %v372_v53 = vadd.f32 %v363_v32, %v354_v24 }
  0x73   : > { %v2948_v34 = vmul.f32 0.6931472, %v2326_v63  ;;  %v475_v10 = vmul.f32 1.442695, %v460_v11  ;;  %2343 = vpow2.f32 %v602_v41  ;;  %v583_v43 = vmul.f32 1.442695, %v568_v37 }
  0x75   : > { %v2328_v30 = vpop.eup %2327  ;;  %v487_v28 = vmul.f32 -0.35, %v2948_v34  ;;  %2345 = vpow2.f32 %v475_v10  ;;  %v509_v10 = vmul.f32 %v2733_v26, %v2465_v2  ;;  %v595_v57 = vmul.f32 0.15, %v2948_v34 }
  0x76   : > { %v2330_v52 = vpop.eup %2329  ;;  %v433_v36 = vmul.f32 0.6931472, %v2328_v30  ;;  %v566_v30 = vmul.f32 0.15, %v2737_v35  ;;  %2347 = vpow2.f32 %v604_v55  ;;  %v594_v35 = vmul.f32 0.15, %v2785_v31 }
  0x77   : > { %v451_v47 = vmul.f32 0.6931472, %v2330_v52  ;;  %v502_v63 = vmul.f32 1.442695, %v487_v28  ;;  %v2332_v44 = vpop.eup %2331  ;;  %v408_v28 = vadd.f32 %v399_v12, %v390_v6  ;;  %v628_v2 = vmul.f32 %v2835_v0, %v2835_v0 }
  0x78   : > { %v461_v45 = vmul.f32 -0.35, %v433_v36  ;;  %v579_v52 = vmul.f32 1.442695, %v566_v30  ;;  %v2334_v27 = vpop.eup %2333  ;;  %v569_v11 = vmul.f32 0.15, %v433_v36  ;;  %v517_v36 = vmul.f32 %v2744_v54, %v2490_v8 }
  0x79   : > { %v488_v15 = vmul.f32 -0.35, %v451_v47  ;;  %2349 = vpow2.f32 %v502_v63  ;;  %v2336_v14 = vpop.eup %2335  ;;  %v608_v17 = vmul.f32 1.442695, %v594_v35  ;;  %v596_v58 = vmul.f32 0.15, %v451_v47 }
  0x7a   : > { %v477_v61 = vmul.f32 1.442695, %v461_v45  ;;  %v2338_v7 = vpop.eup %2337  ;;  %v508_v45 = vmul.f32 %v2727_v20, %v2462_v1  ;;  %v585_v30 = vmul.f32 1.442695, %v569_v11  ;;  %v381_v8 = vadd.f32 1e-12, %v372_v53 }
  0x7b   : > { %v504_v59 = vmul.f32 1.442695, %v488_v15  ;;  %v2340_v31 = vpop.eup %2339  ;;  %v518_v15 = vmul.f32 %v2752_v62, %v2493_v9  ;;  %v417_v26 = vadd.f32 1e-12, %v408_v28  ;;  %v638_v9 = vsel %vm634_vm2, %v627_v38, 0.0  ;;  %v3289_v28 = vld [vmem:[#allocation3_spill] sm:$0xff] }
  0x7c   : > { %2351 = vpow2.f32 %v477_v61  ;;  %v2342_v41 = vpop.eup %2341  ;;  %v526_v61 = vsub.f32 %v508_v45, %v517_v36  ;;  %v629_v62 = vmul.f32 %v2873_v50, %v2873_v50  ;;  %v612_v5 = vmul.f32 1.442695, %v596_v58  ;;  %v3290_v45 = vld [vmem:[#allocation10_spill] sm:$0xff] }
  0x7d   : > { %2353 = vpow2.f32 %v504_v59  ;;  %v2344_v55 = vpop.eup %2343  ;;  %v527_v1 = vsub.f32 %v509_v10, %v518_v15  ;;  %v537_v35 = vmul.f32 %v2791_v3, %v2510_v16  ;;  %v546_v50 = vmul.f32 %v2813_v18, %v2522_v22 }
  0x7e   : > { %2355 = vpow2.f32 %v579_v52  ;;  %v625_v34 = vmul.f32 %v526_v61, %v526_v61  ;;  %v610_v52 = vmul.f32 1.442695, %v595_v57  ;;  %v547_v16 = vmul.f32 %v2817_v25, %v2525_v23  ;;  %v3291_v61 = vld [vmem:[#allocation4_spill] sm:$0xff] }
  0x7f   : > { %2357 = vpow2.f32 %v581_v40  ;;  %v2976_v63 = vpop.eup %2345  ;;  %v626_v47 = vmul.f32 %v527_v1, %v527_v1  ;;  %v555_v3 = vsub.f32 %v537_v35, %v546_v50  ;;  %v3004_v38 = vsub.f32 %v2340_v31, %v2344_v55 }
  0x80   : > { %2359 = vpow2.f32 %v606_v19  ;;  %v2348_v20 = vpop.eup %2347  ;;  %v514_v32 = vmul.f32 %v2976_v63, %v2686_v39  ;;  %v635_v0 = vsel %vm634_vm2, %v625_v34, 0.0  ;;  %v2994_v39 = vsub.f32 %v2332_v44, %v2336_v14 }
  0x81   : > { %2361 = vpow2.f32 %v608_v17  ;;  %v636_v40 = vsel %vm634_vm2, %v626_v47, 0.0  ;;  %v2996_v19 = vsub.f32 %v2334_v27, %v2338_v7  ;;  %v538_v17 = vmul.f32 %v2795_v4, %v2519_v21 }
  0x82   : > { %2363 = vpow2.f32 %v583_v43  ;;  %v637_v6 = vadd.f32 %v636_v40, %v635_v0  ;;  %v640_v44 = vsel %vm634_vm2, %v628_v2, 0.0  ;;  %v539_v27 = vmul.f32 %v2838_v56, %v2530_v29  ;;  %v3287_v43 = vld [vmem:[#allocation2_spill] sm:$0xff]  ;;  %v3288_v29 = vld [vmem:[#allocation9_spill] sm:$0xff] }
  0x83   : > { %v2350_v54 = vpop.eup %2349  ;;  %2365 = vpow2.f32 %v585_v30  ;;  %v548_v21 = vmul.f32 %v2854_v13, %v2538_v33  ;;  %v556_v4 = vsub.f32 %v538_v17, %v547_v16  ;;  %v3015_v25 = vsub.f32 %v2342_v41, %v2348_v20  ;;  %v3292_v20 = vld [vmem:[#allocation6_spill] sm:$0xff] }
  0x84   : > { %v523_v24 = vmul.f32 %v2350_v54, %v2695_v46  ;;  %2367 = vpow2.f32 %v610_v52  ;;  %v639_v18 = vadd.f32 %v638_v9, %v637_v6  ;;  %v630_v7 = vmul.f32 %v2876_v51, %v2876_v51 }
  0x85   : > { %2369 = vpow2.f32 %v612_v5  ;;  %v642_v31 = vsel %vm634_vm2, %v629_v62, 0.0  ;;  %v540_v56 = vmul.f32 %v3288_v29, %v3287_v43  ;;  %v549_v10 = vmul.f32 %v3290_v45, %v3289_v28  ;;  %v3294_v5 = vld [vmem:[#allocation7_spill] sm:$0xff] }
  0x86   : > { %v2352_v59 = vpop.eup %2351  ;;  %v641_v23 = vadd.f32 %v640_v44, %v639_v18  ;;  %2371 = vlog2.f32 %v381_v8  ;;  %v557_v41 = vsub.f32 %v539_v27, %v548_v21  ;;  %v644_v58 = vsel %vm634_vm2, %v630_v7, 0.0  ;;  %v3295_v44 = vld [vmem:[#allocation8_spill] sm:$0xff] }
  0x87   : > { %v2354_v12 = vpop.eup %2353  ;;  %v515_v22 = vmul.f32 %v2352_v59, %v2689_v42  ;;  %2373 = vlog2.f32 %v417_v26  ;;  %v541_v1 = vmul.f32 %v2976_v63, %v3291_v61  ;;  %v550_v2 = vmul.f32 %v2350_v54, %v3292_v20 }
  0x88   : > { %v2991_v37 = vpop.eup %2355  ;;  %v524_v46 = vmul.f32 %v2354_v12, %v2698_v48  ;;  %v532_v48 = vsub.f32 %v514_v32, %v523_v24  ;;  %v643_v13 = vadd.f32 %v642_v31, %v641_v23  ;;  %v558_v8 = vsub.f32 %v540_v56, %v549_v10  ;;  %v3293_v32 = vld [vmem:[#allocation5_spill] sm:$0xff] }
  0x89   : > { %v2998_v11 = vpop.eup %2357  ;;  %v664_v34 = vmul.f32 %v555_v3, %v555_v3  ;;  %v542_v52 = vmul.f32 %v2352_v59, %v3293_v32  ;;  %v551_v0 = vmul.f32 %v2354_v12, %v3294_v5  ;;  %v559_v40 = vsub.f32 %v541_v1, %v550_v2 }
  0x8a   : > { %v3013_v14 = vpop.eup %2359  ;;  %v533_v51 = vsub.f32 %v515_v22, %v524_v46  ;;  %v631_v55 = vmul.f32 %v532_v48, %v532_v48  ;;  %v645_v9 = vadd.f32 %v644_v58, %v643_v13  ;;  %v665_v35 = vmul.f32 %v556_v4, %v556_v4 }
  0x8b   : > { %v3017_v42 = vpop.eup %2361  ;;  %v666_v6 = vmul.f32 %v557_v41, %v557_v41  ;;  %v560_v3 = vsub.f32 %v542_v52, %v551_v0  ;;  %v667_v59 = vmul.f32 %v558_v8, %v558_v8  ;;  %v674_v12 = vsel %vm634_vm2, %v664_v34, 0.0 }
  0x8c   : > { %v2364_v53 = vpop.eup %2363  ;;  %v632_v26 = vmul.f32 %v533_v51, %v533_v51  ;;  %v646_v62 = vsel %vm634_vm2, %v631_v55, 0.0  ;;  %v675_v27 = vadd.f32 %v674_v12, %v3295_v44  ;;  %v676_v21 = vsel %vm634_vm2, %v665_v35, 0.0 }
  0x8d   : > { %v2366_v30 = vpop.eup %2365  ;;  %v647_v63 = vadd.f32 %v646_v62, %v645_v9  ;;  %v668_v48 = vmul.f32 %v559_v40, %v559_v40  ;;  %v678_v7 = vsel %vm634_vm2, %v666_v6, 0.0  ;;  %v697_v31 = vmul.f32 %v2994_v39, %v2994_v39 }
  0x8e   : > { %v648_v54 = vsel %vm634_vm2, %v632_v26, 0.0  ;;  %v2368_v17 = vpop.eup %2367  ;;  %v669_v56 = vmul.f32 %v560_v3, %v560_v3  ;;  %v620_v13 = vsub.f32 %v2991_v37, %v3013_v14  ;;  %v698_v28 = vmul.f32 %v2996_v19, %v2996_v19 }
  0x8f   : > { %v3038_v22 = vadd.f32 %v648_v54, %v647_v63  ;;  %v2370_v46 = vpop.eup %2369  ;;  %v680_v10 = vsel %vm634_vm2, %v667_v59, 0.0  ;;  %v621_v41 = vsub.f32 %v2998_v11, %v3017_v42  ;;  %v699_v55 = vmul.f32 %v3004_v38, %v3004_v38 }
  0x90   : > { %v2372_v43 = vpop.eup %2371  ;;  %v623_v39 = vsub.f32 %v2366_v30, %v2370_v46  ;;  %v682_v14 = vsel %vm634_vm2, %v668_v48, 0.0  ;;  %v701_v42 = vmul.f32 %v620_v13, %v620_v13  ;;  %v707_v30 = vsel %vm634_vm2, %v698_v28, 0.0 }
  0x91   : > { %v2374_v45 = vpop.eup %2373  ;;  %v435_v61 = vmul.f32 0.6931472, %v2372_v43  ;;  %v684_v38 = vsel %vm634_vm2, %v669_v56, 0.0  ;;  %v702_v26 = vmul.f32 %v621_v41, %v621_v41 }
  0x92   : > { %v453_v20 = vmul.f32 0.6931472, %v2374_v45  ;;  %v713_v0 = vsel %vm634_vm2, %v701_v42, 0.0  ;;  %v704_v63 = vmul.f32 %v623_v39, %v623_v39 }
  0x93   : > { %v462_v40 = vmul.f32 -0.35, %v435_v61  ;;  %v715_v54 = vsel %vm634_vm2, %v702_v26, 0.0 }
  0x94   : > { %v597_v43 = vmul.f32 0.15, %v453_v20 }
  0x95   : > { %v479_v12 = vmul.f32 1.442695, %v462_v40 }
  0x96   : > { %v614_v45 = vmul.f32 1.442695, %v597_v43 }
  0x97   : > { %2375 = vpow2.f32 %v479_v12 }
 0x11c   : > { %v2043_v33 = vpop.f32.mrb[0].mxu0 }
 0x11d   : > { %1464 = vrot.lane.b32.xlu0 %v2043_v33, %s2399_s10  ;;  %v1079_v15 = vpop.f32.mrb[1].mxu0  ;;  %v677_v33 = vadd.f32 %v676_v21, %v675_v27  ;;  %v719_v27 = vsel %vm634_vm2, %v704_v63, 0.0 }
 0x11e   : > { %v2127_v36 = vpop.f32.mrb[0].mxu1 }
 0x11f   : > { %1504 = vrot.lane.b32.xlu1 %v2127_v36, %s2399_s10  ;;  %v1375_v57 = vpop.f32.mrb[1].mxu1  ;;  %v622_v36 = vsub.f32 %v2364_v53, %v2368_v17  ;;  %v679_v51 = vadd.f32 %v678_v7, %v677_v33  ;;  %v706_v53 = vsel %vm634_vm2, %v697_v31, 0.0  ;;  %v570_v7 = vmul.f32 0.15, %v435_v61 }
 0x120   : > { %v2046_v47 = vpop.f32.mrb[2].mxu0  ;;  %v708_v1 = vadd.f32 %v707_v30, %v706_v53 }
 0x121   : > { %1462 = vrot.lane.b32.xlu0 %v1079_v15, %s2399_s10  ;;  %v1089_v24 = vpop.f32.mrb[3].mxu0  ;;  %v681_v11 = vadd.f32 %v680_v10, %v679_v51  ;;  %v703_v5 = vmul.f32 %v622_v36, %v622_v36  ;;  %v587_v28 = vmul.f32 1.442695, %v570_v7  ;;  %v2376_v10 = vpop.eup %2375 }
 0x122   : > { %v2130_v50 = vpop.f32.mrb[2].mxu1  ;;  %v516_v36 = vmul.f32 %v2376_v10, %v2742_v49 }
 0x123   : > { %1502 = vrot.lane.b32.xlu1 %v1375_v57, %s2399_s10  ;;  %v1385_v16 = vpop.f32.mrb[3].mxu1  ;;  %v700_v57 = vmul.f32 %v3015_v25, %v3015_v25  ;;  %v709_v25 = vsel %vm634_vm2, %v699_v55, 0.0  ;;  %v683_v8 = vadd.f32 %v682_v14, %v681_v11  ;;  %v717_v59 = vsel %vm634_vm2, %v703_v5, 0.0  ;;  %v2390_v14 = vld [vmem:[%s2478_s13 + $0x40] sm:$0x1] }
 0x124   : > { %v2049_v18 = vpop.f32.mrb[4].mxu0 }
 0x125   : > { %1468 = vrot.lane.b32.xlu0 %v2046_v47, %s2399_s10  ;;  %v1099_v23 = vpop.f32.mrb[5].mxu0  ;;  %v711_v9 = vsel %vm634_vm2, %v700_v57, 0.0  ;;  %v710_v47 = vadd.f32 %v709_v25, %v708_v1  ;;  %v3077_v52 = vadd.f32 %v684_v38, %v683_v8  ;;  %v2389_v57 = vld [vmem:[%s2459_s7 + $0x40] sm:$0x1] }
 0x126   : > { %v2133_v4 = vpop.f32.mrb[4].mxu1 }
 0x127   : > { %1508 = vrot.lane.b32.xlu1 %v2130_v50, %s2399_s10  ;;  %v1395_v29 = vpop.f32.mrb[5].mxu1  ;;  %v712_v35 = vadd.f32 %v711_v9, %v710_v47  ;;  %v489_v50 = vmul.f32 -0.35, %v453_v20 }
 0x128   : > { %v2052_v15 = vpop.f32.mrb[6].mxu0 }
 0x129   : > { %1466 = vrot.lane.b32.xlu0 %v1089_v24, %s2399_s10  ;;  %v1109_v19 = vpop.f32.mrb[7].mxu0 }
 0x12a   : > { %v2136_v37 = vpop.f32.mrb[6].mxu1 }
 0x12b   : > { %1506 = vrot.lane.b32.xlu1 %v1385_v16, %s2399_s10  ;;  %v1405_v58 = vpop.f32.mrb[7].mxu1  ;;  %v714_v16 = vadd.f32 %v713_v0, %v712_v35 }
 0x12c   : > { %v3066_v2 = vpop.f32.mrb[8].mxu0 }
 0x12d   : > { %1472 = vrot.lane.b32.xlu0 %v2049_v18, %s2399_s10  ;;  %v3072_v34 = vpop.f32.mrb[9].mxu0  ;;  %v716_v46 = vadd.f32 %v715_v54, %v714_v16  ;;  %v506_v18 = vmul.f32 1.442695, %v489_v50 }
 0x12e   : > { %v3069_v62 = vpop.f32.mrb[8].mxu1 }
 0x12f   : > { %1512 = vrot.lane.b32.xlu1 %v2133_v4, %s2399_s10  ;;  %v3075_v32 = vpop.f32.mrb[9].mxu1  ;;  %2377 = vpow2.f32 %v506_v18 }
 0x130   : > { %v3080_v24 = vpop.f32.mrb[10].mxu0  ;;  %2379 = vpow2.f32 %v587_v28 }
 0x131   : > { %1470 = vrot.lane.b32.xlu0 %v1099_v23, %s2399_s10  ;;  %v3086_v17 = vpop.f32.mrb[11].mxu0  ;;  %v718_v23 = vadd.f32 %v717_v59, %v716_v46  ;;  %2381 = vpow2.f32 %v614_v45 }
 0x132   : > { %v3083_v6 = vpop.f32.mrb[10].mxu1 }
 0x133   : > { %1510 = vrot.lane.b32.xlu1 %v1395_v29, %s2399_s10  ;;  %v3089_v3 = vpop.f32.mrb[11].mxu1  ;;  %v720_v31 = vadd.f32 %v719_v27, %v718_v23 }
 0x134   : > { %v3092_v44 = vpop.f32.mrb[12].mxu0 }
 0x135   : > { %1474 = vrot.lane.b32.xlu0 %v1109_v19, %s2399_s10  ;;  %v3098_v4 = vpop.f32.mrb[13].mxu0  ;;  %v543_v19 = vmul.f32 %v2389_v57, %v2376_v10 }
 0x136   : > { %v3095_v21 = vpop.f32.mrb[12].mxu1 }
 0x137   : > { %1514 = vrot.lane.b32.xlu1 %v1405_v58, %s2399_s10  ;;  %v3101_v48 = vpop.f32.mrb[13].mxu1 }
 0x138   : > { %v3103_v29 = vpop.f32.mrb[14].mxu0 }
 0x139   : > { %1476 = vrot.lane.b32.xlu0 %v2052_v15, %s2399_s10  ;;  %v3108_v33 = vpop.f32.mrb[15].mxu0  ;;  %v2378_v41 = vpop.eup %2377 }
 0x13a   : > { %v3105_v56 = vpop.f32.mrb[14].mxu1  ;;  %v525_v39 = vmul.f32 %v2378_v41, %v2750_v60  ;;  %v2380_v51 = vpop.eup %2379  ;;  %v552_v58 = vmul.f32 %v2390_v14, %v2378_v41 }
 0x13b   : > { %1516 = vrot.lane.b32.xlu1 %v2136_v37, %s2399_s10  ;;  %v3111_v13 = vpop.f32.mrb[15].mxu1  ;;  %v2382_v15 = vpop.eup %2381 }
 0x13c   : > { %v534_v55 = vsub.f32 %v516_v36, %v525_v39  ;;  %v624_v11 = vsub.f32 %v2380_v51, %v2382_v15  ;;  %v561_v42 = vsub.f32 %v543_v19, %v552_v58 }
 0x13e   : > { %v633_v37 = vmul.f32 %v534_v55, %v534_v55  ;;  %v705_v30 = vmul.f32 %v624_v11, %v624_v11  ;;  %v670_v61 = vmul.f32 %v561_v42, %v561_v42 }
 0x140   : > { %v651_v53 = vsel %vm650_vm3, %v633_v37, 0.0  ;;  %v721_v1 = vsel %vm650_vm3, %v705_v30, 0.0  ;;  %v686_v49 = vsel %vm650_vm3, %v670_v61, 0.0 }
 0x141   : > { %v652_v38 = vadd.f32 %v651_v53, %v3038_v22  ;;  %v722_v60 = vadd.f32 %v721_v1, %v720_v31  ;;  %v687_v25 = vadd.f32 %v686_v49, %v3077_v52 }
 0x158   : > { %653 = vadd.xlane.f32.xlu0 %v652_v38 }
 0x15c   : > { %723 = vadd.xlane.f32.xlu0 %v722_v60 }
 0x15f   : > { %688 = vadd.xlane.f32.xlu1 %v687_v25 }
 0x18f   : > { %v1465_v20 = vpop.permute.xlu0 %1464 }
 0x190   : > { %v3129_v35 = vadd.f32 %v3066_v2, %v1465_v20 }
 0x191   : > { %v1505_v8 = vpop.permute.xlu1 %1504 }
 0x192   : > { %v3126_v40 = vadd.f32 %v3069_v62, %v1505_v8 }
 0x193   : > { %v1463_v26 = vpop.permute.xlu0 %1462 }
 0x194   : > { %v3123_v5 = vadd.f32 %v1463_v26, %v3072_v34  ;;  %v1568_v34 = vmul.f32 %v3126_v40, %v3126_v40  ;;  %v1535_v62 = vmul.f32 %v3126_v40, %v3129_v35 }
 0x195   : > { %v1503_v9 = vpop.permute.xlu1 %1502 }
 0x196   : > { %v3120_v47 = vadd.f32 %v1503_v9, %v3075_v32  ;;  %v1576_v23 = vsel %vm1542_vm4, %v1568_v34, 0.0 }
 0x197   : > { %v1469_v0 = vpop.permute.xlu0 %1468 }
 0x198   : > { %v1567_v52 = vmul.f32 %v3120_v47, %v3120_v47  ;;  %v1534_v50 = vmul.f32 %v3120_v47, %v3123_v5  ;;  %v3149_v59 = vadd.f32 %v3080_v24, %v1469_v0 }
 0x199   : > { %v1509_v22 = vpop.permute.xlu1 %1508 }
 0x19a   : > { %v3146_v16 = vadd.f32 %v3083_v6, %v1509_v22  ;;  %v1575_v12 = vsel %vm1542_vm4, %v1567_v52, 0.0  ;;  %v1544_v6 = vsel %vm1542_vm4, %v1535_v62, 0.0 }
 0x19b   : > { %v1467_v63 = vpop.permute.xlu0 %1466  ;;  %v1577_v31 = vadd.f32 %v1576_v23, %v1575_v12 }
 0x19c   : > { %v3136_v54 = vadd.f32 %v1467_v63, %v3086_v17  ;;  %v1543_v17 = vsel %vm1542_vm4, %v1534_v50, 0.0  ;;  %v1570_v28 = vmul.f32 %v3146_v16, %v3146_v16  ;;  %v1537_v45 = vmul.f32 %v3146_v16, %v3149_v59 }
 0x19d   : > { %v1507_v32 = vpop.permute.xlu1 %1506  ;;  %v1545_v43 = vadd.f32 %v1544_v6, %v1543_v17 }
 0x19e   : > { %v3143_v2 = vadd.f32 %v1507_v32, %v3089_v3  ;;  %v1580_v19 = vsel %vm1542_vm4, %v1570_v28, 0.0  ;;  %v1548_v14 = vsel %vm1542_vm4, %v1537_v45, 0.0 }
 0x19f   : > { %v1473_v27 = vpop.permute.xlu0 %1472 }
 0x1a0   : > { %v1569_v46 = vmul.f32 %v3143_v2, %v3143_v2  ;;  %v1536_v18 = vmul.f32 %v3143_v2, %v3136_v54  ;;  %v3169_v41 = vadd.f32 %v3092_v44, %v1473_v27 }
 0x1a1   : > { %v1513_v3 = vpop.permute.xlu1 %1512 }
 0x1a2   : > { %v1578_v7 = vsel %vm1542_vm4, %v1569_v46, 0.0  ;;  %v1546_v24 = vsel %vm1542_vm4, %v1536_v18, 0.0  ;;  %v3166_v10 = vadd.f32 %v3095_v21, %v1513_v3 }
 0x1a3   : > { %v1471_v36 = vpop.permute.xlu0 %1470  ;;  %v1579_v39 = vadd.f32 %v1578_v7, %v1577_v31  ;;  %v1547_v51 = vadd.f32 %v1546_v24, %v1545_v43 }
 0x1a4   : > { %v3172_v15 = vadd.f32 %v1471_v36, %v3098_v4  ;;  %v1572_v21 = vmul.f32 %v3166_v10, %v3166_v10  ;;  %v1539_v44 = vmul.f32 %v3166_v10, %v3169_v41 }
 0x1a5   : > { %v1511_v55 = vpop.permute.xlu1 %1510  ;;  %v1549_v11 = vadd.f32 %v1548_v14, %v1547_v51  ;;  %v1581_v53 = vadd.f32 %v1580_v19, %v1579_v39 }
 0x1a6   : > { %v3175_v57 = vadd.f32 %v1511_v55, %v3101_v48  ;;  %v1552_v60 = vsel %vm1542_vm4, %v1539_v44, 0.0  ;;  %v1584_v8 = vsel %vm1542_vm4, %v1572_v21, 0.0 }
 0x1a7   : > { %v1475_v37 = vpop.permute.xlu0 %1474 }
 0x1a8   : > { %v1571_v58 = vmul.f32 %v3175_v57, %v3175_v57  ;;  %v1538_v4 = vmul.f32 %v3175_v57, %v3172_v15  ;;  %v3188_v42 = vadd.f32 %v1475_v37, %v3108_v33 }
 0x1a9   : > { %v1515_v48 = vpop.permute.xlu1 %1514 }
 0x1aa   : > { %v1582_v30 = vsel %vm1542_vm4, %v1571_v58, 0.0  ;;  %v1550_v61 = vsel %vm1542_vm4, %v1538_v4, 0.0  ;;  %v3193_v38 = vadd.f32 %v1515_v48, %v3111_v13 }
 0x1ab   : > { %v1551_v1 = vadd.f32 %v1550_v61, %v1549_v11  ;;  %v1583_v49 = vadd.f32 %v1582_v30, %v1581_v53  ;;  %v1477_v33 = vpop.permute.xlu0 %1476 }
 0x1ac   : > { %v1573_v25 = vmul.f32 %v3193_v38, %v3193_v38  ;;  %v1540_v20 = vmul.f32 %v3193_v38, %v3188_v42  ;;  %v3202_v9 = vadd.f32 %v3103_v29, %v1477_v33 }
 0x1ad   : > { %v1517_v26 = vpop.permute.xlu1 %1516  ;;  %v1585_v0 = vadd.f32 %v1584_v8, %v1583_v49  ;;  %v1553_v13 = vadd.f32 %v1552_v60, %v1551_v1 }
 0x1ae   : > { %v3205_v22 = vadd.f32 %v3105_v56, %v1517_v26  ;;  %v1586_v52 = vsel %vm1542_vm4, %v1573_v25, 0.0  ;;  %v1554_v50 = vsel %vm1542_vm4, %v1540_v20, 0.0 }
 0x1af   : > { %v1587_v34 = vadd.f32 %v1586_v52, %v1585_v0  ;;  %v1555_v62 = vadd.f32 %v1554_v50, %v1553_v13 }
 0x1b0   : > { %v1541_v63 = vmul.f32 %v3205_v22, %v3202_v9  ;;  %v1574_v32 = vmul.f32 %v3205_v22, %v3205_v22 }
 0x1b2   : > { %v1588_v29 = vsel %vm1542_vm4, %v1574_v32, 0.0  ;;  %v1556_v12 = vsel %vm1542_vm4, %v1541_v63, 0.0 }
 0x1b3   : > { %v1589_v17 = vadd.f32 %v1588_v29, %v1587_v34  ;;  %v1557_v46 = vadd.f32 %v1556_v12, %v1555_v62 }
 0x1b5   : > { %1590 = vadd.xlane.f32.xlu1 %v1589_v17  ;;  %1558 = vadd.xlane.f32.xlu0 %v1557_v46 }
 0x1e5   : > { %v654_v56 = vpop.xlane.xlu0 %653 }
 0x1e6   : > { %v655_v18 = vrot.slane %v654_v56, 4 }
 0x1e8   : > { %v656_v27 = vadd.f32 %v655_v18, %v654_v56 }
 0x1e9   : > { %v724_v3 = vpop.xlane.xlu0 %723 }
 0x1ea   : > { %v657_v23 = vrot.slane %v656_v27, 2  ;;  %v725_v6 = vrot.slane %v724_v3, 4 }
 0x1ec   : > { %v689_v7 = vpop.xlane.xlu1 %688  ;;  %v726_v31 = vadd.f32 %v725_v6, %v724_v3  ;;  %v658_v43 = vadd.f32 %v657_v23, %v656_v27 }
 0x1ed   : > { %v690_v24 = vrot.slane %v689_v7, 4 }
 0x1ee   : > { %v727_v45 = vrot.slane %v726_v31, 2  ;;  %v659_v36 = vrot.slane %v658_v43, 1 }
 0x1ef   : > { %v691_v28 = vadd.f32 %v690_v24, %v689_v7 }
 0x1f0   : > { %v660_v51 = vadd.f32 %v659_v36, %v658_v43  ;;  %v728_v55 = vadd.f32 %v727_v45, %v726_v31 }
 0x1f1   : > { %v692_v39 = vrot.slane %v691_v28, 2 }
 0x1f2   : > { %2246 = vpush %v660_v51  ;;  %v729_v14 = vrot.slane %v728_v55, 1 }
 0x1f3   : > { %v693_v19 = vadd.f32 %v692_v39, %v691_v28 }
 0x1f4   : > { %v730_v44 = vadd.f32 %v729_v14, %v728_v55 }
 0x1f5   : > { %v694_v21 = vrot.slane %v693_v19, 1 }
 0x1f7   : > { %v695_v58 = vadd.f32 %v694_v21, %v693_v19 }
 0x1f9   : > { %2248 = vpush %v695_v58 }
 0x1fa   : > { %2250 = vpush %v730_v44 }
 0x223   : > { %s3215_s7 = spop %2246 }
 0x22a   : > { %s3217_s13 = spop %2248 }
 0x22b   : > { %s3219_s17 = spop %2250 }
 0x242   : > { %v1591_v4 = vpop.xlane.xlu1 %1590  ;;  %v1559_v37 = vpop.xlane.xlu0 %1558 }
 0x243   : > { %v1592_v11 = vrot.slane %v1591_v4, 4  ;;  %v1560_v48 = vrot.slane %v1559_v37, 4 }
 0x245   : > { %v1593_v53 = vadd.f32 %v1592_v11, %v1591_v4  ;;  %v1561_v30 = vadd.f32 %v1560_v48, %v1559_v37 }
 0x247   : > { %v1594_v61 = vrot.slane %v1593_v53, 2  ;;  %v1562_v1 = vrot.slane %v1561_v30, 2 }
 0x249   : > { %v1563_v49 = vadd.f32 %v1562_v1, %v1561_v30  ;;  %v1595_v60 = vadd.f32 %v1594_v61, %v1593_v53 }
 0x24b   : > { %v1564_v25 = vrot.slane %v1563_v49, 1  ;;  %v1596_v20 = vrot.slane %v1595_v60, 1 }
 0x24d   : > { %v1565_v33 = vadd.f32 %v1564_v25, %v1563_v49  ;;  %v1597_v8 = vadd.f32 %v1596_v20, %v1595_v60 }
 0x24f   : > { %2252 = vpush %v1565_v33 }
 0x250   : > { %2254 = vpush %v1597_v8 }
 0x280   : > { %s2253_s18 = spop %2252 }
 0x281   : > { %s2255_s19 = spop %2254 }
 0x282   : > { %s1599_s20 = sadd.f32 1e-08, %s2255_s19 }
 0x284   : > { %v1600_v26 = vstv %s1599_s20 }
 0x285   : > { %2383 = vrcp.f32 %v1600_v26 }
 0x28f   : > { %v2384_v0 = vpop.eup %2383 }
 0x290   : > { %2256 = vpush %v2384_v0 }
 0x2c1   : > { %s2257_s23 = spop %2256 }
 0x2c2   : > { %s1603_s24 = smul.f32 %s2257_s23, %s2253_s18 }
 0x2c4   : > { %v1604_v13 = vstv %s1603_s24 }
 0x2c5   : > { %v1605_v52 = vmul.f32 %v1604_v13, %v3120_v47  ;;  %v1606_v50 = vmul.f32 %v1604_v13, %v3126_v40  ;;  %v1607_v63 = vmul.f32 %v1604_v13, %v3143_v2  ;;  %v1608_v32 = vmul.f32 %v1604_v13, %v3146_v16 }
 0x2c6   : > { %v1609_v34 = vmul.f32 %v1604_v13, %v3175_v57  ;;  %v1610_v17 = vmul.f32 %v1604_v13, %v3166_v10  ;;  %v1611_v47 = vmul.f32 %v1604_v13, %v3193_v38  ;;  %v1612_v23 = vmul.f32 %v1604_v13, %v3205_v22 }
 0x2c7   : > { %v1613_v62 = vmul.f32 %v1605_v52, %v1605_v52  ;;  %v1614_v29 = vmul.f32 %v1606_v50, %v1606_v50  ;;  %v1615_v12 = vmul.f32 %v1607_v63, %v1607_v63  ;;  %v1616_v46 = vmul.f32 %v1608_v32, %v1608_v32 }
 0x2c8   : > { %v1617_v27 = vmul.f32 %v1609_v34, %v1609_v34  ;;  %v1645_v16 = vsub.f32 %v3123_v5, %v1605_v52  ;;  %v1646_v57 = vsub.f32 %v3129_v35, %v1606_v50  ;;  %v1647_v3 = vsub.f32 %v3136_v54, %v1607_v63 }
 0x2c9   : > { %v1621_v56 = vsel %vm1542_vm4, %v1613_v62, 0.0  ;;  %v1622_v18 = vsel %vm1542_vm4, %v1614_v29, 0.0  ;;  %v1624_v2 = vsel %vm1542_vm4, %v1615_v12, 0.0  ;;  %v1648_v6 = vsub.f32 %v3149_v59, %v1608_v32 }
 0x2ca   : > { %v1623_v40 = vadd.f32 %v1622_v18, %v1621_v56  ;;  %v1618_v7 = vmul.f32 %v1610_v17, %v1610_v17  ;;  %v1626_v24 = vsel %vm1542_vm4, %v1616_v46, 0.0  ;;  %v1653_v31 = vmul.f32 %v1645_v16, %v1645_v16 }
 0x2cb   : > { %v1654_v38 = vmul.f32 %v1646_v57, %v1646_v57  ;;  %v1649_v28 = vsub.f32 %v3172_v15, %v1609_v34  ;;  %v1655_v45 = vmul.f32 %v1647_v3, %v1647_v3  ;;  %v1619_v36 = vmul.f32 %v1611_v47, %v1611_v47 }
 0x2cc   : > { %v1625_v10 = vadd.f32 %v1624_v2, %v1623_v40  ;;  %v1628_v5 = vsel %vm1542_vm4, %v1617_v27, 0.0  ;;  %v1661_v35 = vsel %vm1542_vm4, %v1653_v31, 0.0  ;;  %v1650_v22 = vsub.f32 %v3169_v41, %v1610_v17 }
 0x2cd   : > { %v1656_v39 = vmul.f32 %v1648_v6, %v1648_v6  ;;  %v1662_v59 = vsel %vm1542_vm4, %v1654_v38, 0.0  ;;  %v1620_v51 = vmul.f32 %v1612_v23, %v1612_v23  ;;  %v1630_v55 = vsel %vm1542_vm4, %v1618_v7, 0.0 }
 0x2ce   : > { %v1627_v43 = vadd.f32 %v1626_v24, %v1625_v10  ;;  %v1663_v19 = vadd.f32 %v1662_v59, %v1661_v35  ;;  %v1651_v21 = vsub.f32 %v3188_v42, %v1611_v47  ;;  %v1657_v15 = vmul.f32 %v1649_v28, %v1649_v28 }
 0x2cf   : > { %v1664_v44 = vsel %vm1542_vm4, %v1655_v45, 0.0  ;;  %v1632_v58 = vsel %vm1542_vm4, %v1619_v36, 0.0  ;;  %v1652_v11 = vsub.f32 %v3202_v9, %v1612_v23  ;;  %v1658_v41 = vmul.f32 %v1650_v22, %v1650_v22 }
 0x2d0   : > { %v1629_v54 = vadd.f32 %v1628_v5, %v1627_v43  ;;  %v1665_v4 = vadd.f32 %v1664_v44, %v1663_v19  ;;  %v1666_v48 = vsel %vm1542_vm4, %v1656_v39, 0.0  ;;  %v1634_v53 = vsel %vm1542_vm4, %v1620_v51, 0.0 }
 0x2d1   : > { %v1659_v1 = vmul.f32 %v1651_v21, %v1651_v21  ;;  %v1668_v49 = vsel %vm1542_vm4, %v1657_v15, 0.0  ;;  %v1660_v60 = vmul.f32 %v1652_v11, %v1652_v11  ;;  %v1670_v25 = vsel %vm1542_vm4, %v1658_v41, 0.0 }
 0x2d2   : > { %v1631_v14 = vadd.f32 %v1630_v55, %v1629_v54  ;;  %v1667_v30 = vadd.f32 %v1666_v48, %v1665_v4  ;;  %v1697_v57 = vlaneseq  ;;  %v1705_v10 = vstv %s3219_s17 }
 0x2d3   : > { %v1672_v33 = vsel %vm1542_vm4, %v1659_v1, 0.0  ;;  %v1674_v9 = vsel %vm1542_vm4, %v1660_v60, 0.0  ;;  %v1707_v7 = vstv %s3217_s13  ;;  %v1709_v31 = vstv %s3215_s7 }
 0x2d4   : > { %v1633_v37 = vadd.f32 %v1632_v58, %v1631_v14  ;;  %v1669_v42 = vadd.f32 %v1668_v49, %v1667_v30  ;;  %v1698_v3 = vshrl.u32 %v1697_v57, 7 }
 0x2d6   : > { %v1635_v61 = vadd.f32 %v1634_v53, %v1633_v37  ;;  %v1671_v20 = vadd.f32 %v1670_v25, %v1669_v42  ;;  %vm1702_vm5 = vcmp.eq.s32.totalorder %v1698_v3, 3  ;;  %vm1701_vm6 = vcmp.eq.s32.totalorder %v1698_v3, 2 }
 0x2d7   : > { %vm1700_vm7 = vcmp.eq.s32.totalorder %v1698_v3, 1  ;;  %vm1699_vm8 = vcmp.eq.s32.totalorder %v1698_v3, 0 }
 0x2d8   : > { %1636 = vadd.xlane.f32.xlu0 %v1635_v61  ;;  %v1673_v8 = vadd.f32 %v1672_v33, %v1671_v20 }
 0x2da   : > { %v1675_v26 = vadd.f32 %v1674_v9, %v1673_v8 }
 0x2dc   : > { %1676 = vadd.xlane.f32.xlu1 %v1675_v26 }
 0x365   : > { %v1637_v0 = vpop.xlane.xlu0 %1636 }
 0x366   : > { %v1638_v13 = vrot.slane %v1637_v0, 4 }
 0x368   : > { %v1639_v52 = vadd.f32 %v1638_v13, %v1637_v0 }
 0x369   : > { %v1677_v32 = vpop.xlane.xlu1 %1676 }
 0x36a   : > { %v1640_v50 = vrot.slane %v1639_v52, 2  ;;  %v1678_v34 = vrot.slane %v1677_v32, 4 }
 0x36c   : > { %v1641_v63 = vadd.f32 %v1640_v50, %v1639_v52  ;;  %v1679_v29 = vadd.f32 %v1678_v34, %v1677_v32 }
 0x36e   : > { %v1642_v62 = vrot.slane %v1641_v63, 1  ;;  %v1680_v17 = vrot.slane %v1679_v29, 2 }
 0x370   : > { %v1643_v12 = vadd.f32 %v1642_v62, %v1641_v63  ;;  %v1681_v46 = vadd.f32 %v1680_v17, %v1679_v29 }
 0x372   : > { %2258 = vpush %v1643_v12  ;;  %v1682_v56 = vrot.slane %v1681_v46, 1 }
 0x374   : > { %v1683_v18 = vadd.f32 %v1682_v56, %v1681_v46 }
 0x376   : > { %2260 = vpush %v1683_v18 }
 0x3a3   : > { %s2259_s25 = spop %2258 }
 0x3a7   : > { %s2261_s26 = spop %2260 }
 0x3a8   : > { %s1685_s27 = sadd.f32 1e-08, %s2261_s26 }
 0x3aa   : > { %v1686_v47 = vstv %s1685_s27 }
 0x3ab   : > { %2385 = vrcp.f32 %v1686_v47 }
 0x3b5   : > { %v2386_v27 = vpop.eup %2385 }
 0x3b6   : > { %2262 = vpush %v2386_v27 }
 0x3e7   : > { %s2263_s29 = spop %2262 }
 0x3e8   : > { %s1689_s30 = smul.f32 %s2263_s29, %s2259_s25 }
 0x3ea   : > { %s1690_s8 = sadd.f32 1e-08, %s1689_s30 }
 0x3ec   : > { %v1691_v40 = vstv %s1690_s8 }
 0x3ed   : > { %2387 = vlog2.f32 %v1691_v40 }
 0x3f7   : > { %v2388_v2 = vpop.eup %2387 }
 0x3f8   : > { %v1693_v16 = vmul.f32 0.6931472, %v2388_v2 }
 0x3fa   : > { %2264 = vpush %v1693_v16 }
 0x42b   : > { %s2265_s9 = spop %2264 }
 0x42c   : > { %s1695_s11 = ssub.f32 0.0, %s2265_s9 }
 0x42e   : > { %s1696_s12 = smul.f32 0.4342945, %s1695_s11 }
 0x430   : > { %v1703_v23 = vstv %s1696_s12 }
 0x431   : > { %v1704_v6 = vsel %vm1702_vm5, %v1703_v23, 0.0 }
 0x432   : > { %v1706_v24 = vsel %vm1701_vm6, %v1705_v10, %v1704_v6 }
 0x433   : > { %v1708_v38 = vsel %vm1700_vm7, %v1707_v7, %v1706_v24 }
 0x434   : > { %v1710_v43 = vsel %vm1699_vm8, %v1709_v31, %v1708_v38 }
 0x435   : > { %1711 = vst [vmem:[%s309_s16] sm:$0xff] %v1710_v43 }
 0x436 PF: > { %s16_s21 = sadd.s32 1, %s2397_s21  }
 0x437   : > { %p13_p4 = scmp.ge.s32.totalorder %s16_s21, 4  }
 0x439   :  { %15 = sbr.rel (!%p13_p4) target bundleno = 1 (0x1), region = 83 }

</bundles_post_ra>
